<compile_context>
chip_gen: v7x
topology: tpu7x:2x2x1
jax: 0.10.0
libtpu: 0.0.40
codegen_flags: <defaults>
</compile_context>

<pallas_src>
import functools

import jax
import jax.numpy as jnp
from jax import lax
from jax.experimental import pallas as pl
from jax.experimental.pallas import tpu as pltpu

# ----------------------- small synthetic BERT config -----------------------
VOCAB = 128          # "text_tokenizer_num"
HIDDEN = 32
N_LAYERS = 2
N_HEADS = 4
HEAD_DIM = HIDDEN // N_HEADS
INTER = 64
MAX_POS = 64
LN_EPS = 1e-12

BATCH = 2
SEQ = 8

# ------------------- packed small-vector slab layout (rows) -----------------
ROW_EMB_LN_G = 0
ROW_EMB_LN_B = 1
ROW_CLS_B = 2
ROW_CLS_LN_G = 3
ROW_CLS_LN_B = 4
ROW_DEC_B = 5
ROW_POS = 6                     # rows ROW_POS .. ROW_POS+seq-1 hold pos_emb+tok_emb[0]
ROWS_PER_LAYER = 8
(OFF_BQKV, OFF_BO, OFF_LN1_G, OFF_LN1_B,
 OFF_B1, OFF_B2, OFF_LN2_G, OFF_LN2_B) = range(ROWS_PER_LAYER)


# ------------------------------ fused kernel --------------------------------
def _gelu(x):
    # exact (erf-based) GELU, matching HF BERT hidden_act="gelu"
    return 0.5 * x * (1.0 + lax.erf(x * 0.7071067811865475))


def _layernorm(x, g, b):
    mean = jnp.mean(x, axis=-1, keepdims=True)
    c = x - mean
    var = jnp.mean(c * c, axis=-1, keepdims=True)
    return c * lax.rsqrt(var + LN_EPS) * g + b


def _softmax_lastdim(s):
    s = s - jnp.max(s, axis=-1, keepdims=True)
    p = jnp.exp(s)
    return p * pl.reciprocal(jnp.sum(p, axis=-1, keepdims=True), approx=True)


def _bert_mlm_kernel(ids_ref, amask_ref, vec_ref,
                     word_emb_ref, word_emb_t_ref,
                     wqkv_ref, wo_ref, w1_ref, w2_ref, cls_w_ref,
                     out_ref, *, batch, seq):
    f32 = jnp.float32
    bs = batch * seq
    layer_base = ROW_POS + seq

    def vrow(r, width=HIDDEN):
        # static (1, width) slice out of the packed slab — free.
        return vec_ref[r:r + 1, 0:width]

    # ---- in-kernel embedding gather: one-hot matmul on the resident table ----
    ids = ids_ref[...]                                               # (bs, 1) int32
    one_hot = (ids == lax.broadcasted_iota(jnp.int32, (bs, VOCAB), 1)).astype(f32)
    x = jnp.dot(one_hot, word_emb_ref[...], preferred_element_type=f32)   # (bs, H)
    pos_tok = vec_ref[ROW_POS:ROW_POS + seq, 0:HIDDEN]               # (seq, H)
    x = x + jnp.tile(pos_tok, (batch, 1))
    x = _layernorm(x, vrow(ROW_EMB_LN_G), vrow(ROW_EMB_LN_B))

    # ---- in-kernel additive key mask, materialized ONCE (hoisted) ----
    neg = (1.0 - amask_ref[...]) * (-1e9)                            # (batch, seq)
    mask_bss = jnp.broadcast_to(neg[:, None, :], (batch, seq, seq))  # (B, Sq, Sk)

    for l in range(N_LAYERS):                                        # static unroll
        base = layer_base + l * ROWS_PER_LAYER

        # ---- fused QKV projection (scale already folded into Q weights) ----
        qkv = (jnp.dot(x, wqkv_ref[l], preferred_element_type=f32)
               + vrow(base + OFF_BQKV, 3 * HIDDEN))                  # (bs, 3H)

        # ---- multi-head attention; output projection folded per head ----
        wo_l = wo_ref[l]                                             # (H, H)
        attn = jnp.zeros((bs, HIDDEN), f32)
        for h in range(N_HEADS):                                     # static unroll
            q = qkv[:, h * HEAD_DIM:(h + 1) * HEAD_DIM].reshape(batch, seq, HEAD_DIM)
            k = qkv[:, HIDDEN + h * HEAD_DIM:HIDDEN + (h + 1) * HEAD_DIM].reshape(batch, seq, HEAD_DIM)
            v = qkv[:, 2 * HIDDEN + h * HEAD_DIM:2 * HIDDEN + (h + 1) * HEAD_DIM].reshape(batch, seq, HEAD_DIM)
            s = jnp.einsum('bqd,bkd->bqk', q, k, preferred_element_type=f32)
            p = _softmax_lastdim(s + mask_bss)
            c = jnp.einsum('bqk,bkd->bqd', p, v,
                           preferred_element_type=f32).reshape(bs, HEAD_DIM)
            # per-head output projection — no lane concat of head contexts
            attn = attn + jnp.dot(c, wo_l[h * HEAD_DIM:(h + 1) * HEAD_DIM, :],
                                  preferred_element_type=f32)
        attn = attn + vrow(base + OFF_BO)
        x = _layernorm(attn + x, vrow(base + OFF_LN1_G), vrow(base + OFF_LN1_B))

        # ---- FFN (GELU) + residual + LN2 ----
        h1 = _gelu(jnp.dot(x, w1_ref[l], preferred_element_type=f32)
                   + vrow(base + OFF_B1, INTER))
        h2 = jnp.dot(h1, w2_ref[l], preferred_element_type=f32) + vrow(base + OFF_B2)
        x = _layernorm(h2 + x, vrow(base + OFF_LN2_G), vrow(base + OFF_LN2_B))

    # ---- MLM head: dense + GELU + LN + tied decoder (lane-dense RHS) ----
    hc = _gelu(jnp.dot(x, cls_w_ref[...], preferred_element_type=f32) + vrow(ROW_CLS_B))
    hc = _layernorm(hc, vrow(ROW_CLS_LN_G), vrow(ROW_CLS_LN_B))
    logits = (jnp.dot(hc, word_emb_t_ref[...], preferred_element_type=f32)
              + vrow(ROW_DEC_B, VOCAB))
    out_ref[...] = logits.astype(out_ref.dtype)                      # (bs, 128) lane-dense


# --------------------------- params & forward glue ---------------------------
def init_params(key):
    keys = iter(jax.random.split(key, 64))

    def w(shape, scale=0.02):
        return scale * jax.random.normal(next(keys), shape, jnp.float32)

    L = N_LAYERS
    return {
        "word_emb": w((VOCAB, HIDDEN)),
        "pos_emb": w((MAX_POS, HIDDEN)),
        "tok_emb": w((2, HIDDEN)),
        "emb_ln_g": jnp.ones((HIDDEN,), jnp.float32),
        "emb_ln_b": jnp.zeros((HIDDEN,), jnp.float32),
        "wqkv": w((L, HIDDEN, 3 * HIDDEN)),
        "bqkv": jnp.zeros((L, 3 * HIDDEN), jnp.float32),
        "wo": w((L, HIDDEN, HIDDEN)),
        "bo": jnp.zeros((L, HIDDEN), jnp.float32),
        "ln1_g": jnp.ones((L, HIDDEN), jnp.float32),
        "ln1_b": jnp.zeros((L, HIDDEN), jnp.float32),
        "w1": w((L, HIDDEN, INTER)),
        "b1": jnp.zeros((L, INTER), jnp.float32),
        "w2": w((L, INTER, HIDDEN)),
        "b2": jnp.zeros((L, HIDDEN), jnp.float32),
        "ln2_g": jnp.ones((L, HIDDEN), jnp.float32),
        "ln2_b": jnp.zeros((L, HIDDEN), jnp.float32),
        "cls_w": w((HIDDEN, HIDDEN)),
        "cls_b": jnp.zeros((HIDDEN,), jnp.float32),
        "cls_ln_g": jnp.ones((HIDDEN,), jnp.float32),
        "cls_ln_b": jnp.zeros((HIDDEN,), jnp.float32),
        "dec_b": jnp.zeros((VOCAB,), jnp.float32),
    }


def prepare_inference_params(params, seq):
    """One-time repacking: fold attn scale into Q weights, pre-transpose the
    tied decoder table, coalesce all small vectors into one (rows, 128) slab."""
    L = N_LAYERS
    scale = 1.0 / (HEAD_DIM ** 0.5)
    wqkv = params["wqkv"].at[:, :, :HIDDEN].multiply(scale)      # scale folded into Wq
    bqkv = params["bqkv"].at[:, :HIDDEN].multiply(scale)         # ... and bq
    pos_tok = params["pos_emb"][:seq] + params["tok_emb"][0]     # token_type_ids == 0

    n_rows = ROW_POS + seq + L * ROWS_PER_LAYER
    vec = jnp.zeros((n_rows, VOCAB), jnp.float32)
    vec = vec.at[ROW_EMB_LN_G, :HIDDEN].set(params["emb_ln_g"])
    vec = vec.at[ROW_EMB_LN_B, :HIDDEN].set(params["emb_ln_b"])
    vec = vec.at[ROW_CLS_B, :HIDDEN].set(params["cls_b"])
    vec = vec.at[ROW_CLS_LN_G, :HIDDEN].set(params["cls_ln_g"])
    vec = vec.at[ROW_CLS_LN_B, :HIDDEN].set(params["cls_ln_b"])
    vec = vec.at[ROW_DEC_B, :VOCAB].set(params["dec_b"])
    vec = vec.at[ROW_POS:ROW_POS + seq, :HIDDEN].set(pos_tok)
    base = ROW_POS + seq
    for l in range(L):
        r = base + l * ROWS_PER_LAYER
        vec = vec.at[r + OFF_BQKV, :3 * HIDDEN].set(bqkv[l])
        vec = vec.at[r + OFF_BO, :HIDDEN].set(params["bo"][l])
        vec = vec.at[r + OFF_LN1_G, :HIDDEN].set(params["ln1_g"][l])
        vec = vec.at[r + OFF_LN1_B, :HIDDEN].set(params["ln1_b"][l])
        vec = vec.at[r + OFF_B1, :INTER].set(params["b1"][l])
        vec = vec.at[r + OFF_B2, :HIDDEN].set(params["b2"][l])
        vec = vec.at[r + OFF_LN2_G, :HIDDEN].set(params["ln2_g"][l])
        vec = vec.at[r + OFF_LN2_B, :HIDDEN].set(params["ln2_b"][l])

    return {
        "vec": vec,
        "word_emb": params["word_emb"],                # (128, 32)  for in-kernel gather
        "word_emb_T": params["word_emb"].T,            # (32, 128)  lane-dense decoder RHS
        "wqkv": wqkv,
        "wo": params["wo"],
        "w1": params["w1"],
        "w2": params["w2"],
        "cls_w": params["cls_w"],
    }


def nlp_model_forward(packed, input_ids, attention_mask):
    """Equivalent of NLP_Model.forward: bert(...) -> last_hidden_state -> cls -> view(-1, V).
    The whole forward is ONE fused, gridless pallas_call (everything resident in VMEM)."""
    B, S = input_ids.shape
    ids2 = input_ids.reshape(B * S, 1).astype(jnp.int32)
    am = attention_mask.astype(jnp.float32)

    return pl.pallas_call(
        functools.partial(_bert_mlm_kernel, batch=B, seq=S),
        out_shape=jax.ShapeDtypeStruct((B * S, VOCAB), jnp.float32),
        compiler_params=pltpu.CompilerParams(vmem_limit_bytes=4 * 1024 * 1024),
    )(ids2, am, packed["vec"], packed["word_emb"], packed["word_emb_T"],
      packed["wqkv"], packed["wo"], packed["w1"], packed["w2"], packed["cls_w"])


# ------------------------------ pure-JAX reference ---------------------------
def _reference_forward(params, input_ids, attention_mask):
    B, S = input_ids.shape
    x = (params["word_emb"][input_ids]
         + params["pos_emb"][:S][None, :, :]
         + params["tok_emb"][0][None, None, :]).reshape(B * S, HIDDEN)

    def ln(t, g, b):
        m = jnp.mean(t, -1, keepdims=True)
        c = t - m
        v = jnp.mean(c * c, -1, keepdims=True)
        return c * lax.rsqrt(v + LN_EPS) * g + b

    x = ln(x, params["emb_ln_g"], params["emb_ln_b"])
    mask = ((1.0 - attention_mask.astype(jnp.float32)) * -1e9).reshape(B, 1, 1, S)
    for l in range(N_LAYERS):
        qkv = x @ params["wqkv"][l] + params["bqkv"][l]
        q, k, v = jnp.split(qkv, 3, axis=-1)

        def heads(t):
            return t.reshape(B, S, N_HEADS, HEAD_DIM).transpose(0, 2, 1, 3)

        q, k, v = heads(q), heads(k), heads(v)
        s = jnp.einsum('bhqd,bhkd->bhqk', q, k) / (HEAD_DIM ** 0.5) + mask
        p = jax.nn.softmax(s, axis=-1)
        c = jnp.einsum('bhqk,bhkd->bhqd', p, v).transpose(0, 2, 1, 3).reshape(B * S, HIDDEN)
        a = c @ params["wo"][l] + params["bo"][l]
        x = ln(a + x, params["ln1_g"][l], params["ln1_b"][l])
        h1 = x @ params["w1"][l] + params["b1"][l]
        h1 = 0.5 * h1 * (1.0 + lax.erf(h1 * 0.7071067811865475))
        h2 = h1 @ params["w2"][l] + params["b2"][l]
        x = ln(h2 + x, params["ln2_g"][l], params["ln2_b"][l])
    h = x @ params["cls_w"] + params["cls_b"]
    h = 0.5 * h * (1.0 + lax.erf(h * 0.7071067811865475))
    h = ln(h, params["cls_ln_g"], params["cls_ln_b"])
    return h @ params["word_emb"].T + params["dec_b"]


# ------------------------------------ main -----------------------------------
if __name__ == "__main__":
    key = jax.random.PRNGKey(0)
    k_param, k_ids = jax.random.split(key)

    params = init_params(k_param)
    input_ids = jax.random.randint(k_ids, (BATCH, SEQ), 0, VOCAB, dtype=jnp.int32)
    attention_mask = jnp.ones((BATCH, SEQ), dtype=jnp.int32)
    attention_mask = attention_mask.at[1, SEQ - 2:].set(0)   # exercise padding mask

    packed = prepare_inference_params(params, SEQ)           # one-time repack / fold

    out = jax.jit(nlp_model_forward)(packed, input_ids, attention_mask)
    out = jax.block_until_ready(out)

    assert out.shape == (BATCH * SEQ, VOCAB), out.shape
    assert out.dtype == jnp.float32
    assert bool(jnp.all(jnp.isfinite(out)))

    ref = _reference_forward(params, input_ids, attention_mask)
    max_err = float(jnp.max(jnp.abs(out - ref)))
    assert max_err < 1e-2, f"max |pallas - ref| = {max_err}"

    print("KERNEL_OK")
</pallas_src>

<mosaic_0001>
module attributes {stable_mosaic.version = 11 : i64} {
  func.func @_bert_mlm_kernel(%arg0: memref<16x1xi32, #tpu.memory_space<vmem>>, %arg1: memref<2x8xf32, #tpu.memory_space<vmem>>, %arg2: memref<30x128xf32, #tpu.memory_space<vmem>>, %arg3: memref<128x32xf32, #tpu.memory_space<vmem>>, %arg4: memref<32x128xf32, #tpu.memory_space<vmem>>, %arg5: memref<2x32x96xf32, #tpu.memory_space<vmem>>, %arg6: memref<2x32x32xf32, #tpu.memory_space<vmem>>, %arg7: memref<2x32x64xf32, #tpu.memory_space<vmem>>, %arg8: memref<2x64x32xf32, #tpu.memory_space<vmem>>, %arg9: memref<32x32xf32, #tpu.memory_space<vmem>>, %arg10: memref<16x128xf32, #tpu.memory_space<vmem>>) attributes {dimension_semantics = [], scalar_prefetch = 0 : i64, scratch_operands = 0 : i64, tpu.core_type = #tpu.core_type<tc>} {
    %c0 = arith.constant 0 : index
    %c0_0 = arith.constant 0 : index
    %0 = vector.load %arg0[%c0, %c0_0] : memref<16x1xi32, #tpu.memory_space<vmem>>, vector<16x1xi32>
    %1 = tpu.iota {dimensions = array<i32: 1>} : vector<16x128xi32>
    %2 = vector.broadcast %0 : vector<16x1xi32> to vector<16x128xi32>
    %3 = arith.cmpi eq, %2, %1 : vector<16x128xi32>
    %4 = arith.extui %3 : vector<16x128xi1> to vector<16x128xi32>
    %5 = arith.sitofp %4 : vector<16x128xi32> to vector<16x128xf32>
    %c0_1 = arith.constant 0 : index
    %c0_2 = arith.constant 0 : index
    %6 = vector.load %arg3[%c0_1, %c0_2] : memref<128x32xf32, #tpu.memory_space<vmem>>, vector<128x32xf32>
    %cst = arith.constant dense<0.000000e+00> : vector<16x32xf32>
    %7 = tpu.matmul %5, %6, %cst {dimension_numbers = #tpu.dot_dimension_numbers<[1], [0], [0], [1], [0, 0, 1, 1], [], []>} : vector<16x128xf32>, vector<128x32xf32>, vector<16x32xf32> -> vector<16x32xf32>
    %c6 = arith.constant 6 : index
    %c0_3 = arith.constant 0 : index
    %8 = vector.load %arg2[%c6, %c0_3] : memref<30x128xf32, #tpu.memory_space<vmem>>, vector<8x32xf32>
    %9 = tpu.concatenate %8, %8 in 0 : vector<8x32xf32>, vector<8x32xf32> -> vector<16x32xf32>
    %10 = arith.addf %7, %9 : vector<16x32xf32>
    %c0_4 = arith.constant 0 : index
    %c0_5 = arith.constant 0 : index
    %11 = vector.load %arg2[%c0_4, %c0_5] : memref<30x128xf32, #tpu.memory_space<vmem>>, vector<1x32xf32>
    %c1 = arith.constant 1 : index
    %c0_6 = arith.constant 0 : index
    %12 = vector.load %arg2[%c1, %c0_6] : memref<30x128xf32, #tpu.memory_space<vmem>>, vector<1x32xf32>
    %cst_7 = arith.constant dense<0.000000e+00> : vector<16xf32>
    %13 = vector.multi_reduction <add>, %10, %cst_7 [1] : vector<16x32xf32> to vector<16xf32>
    %14 = vector.shape_cast %13 : vector<16xf32> to vector<16x1xf32>
    %cst_8 = arith.constant 3.200000e+01 : f32
    %15 = vector.broadcast %cst_8 : f32 to vector<16x1xf32>
    %16 = arith.divf %14, %15 : vector<16x1xf32>
    %17 = vector.broadcast %16 : vector<16x1xf32> to vector<16x32xf32>
    %18 = arith.subf %10, %17 : vector<16x32xf32>
    %19 = arith.mulf %18, %18 : vector<16x32xf32>
    %cst_9 = arith.constant dense<0.000000e+00> : vector<16xf32>
    %20 = vector.multi_reduction <add>, %19, %cst_9 [1] : vector<16x32xf32> to vector<16xf32>
    %21 = vector.shape_cast %20 : vector<16xf32> to vector<16x1xf32>
    %cst_10 = arith.constant 3.200000e+01 : f32
    %22 = vector.broadcast %cst_10 : f32 to vector<16x1xf32>
    %23 = arith.divf %21, %22 : vector<16x1xf32>
    %cst_11 = arith.constant 9.99999996E-13 : f32
    %24 = vector.broadcast %cst_11 : f32 to vector<16x1xf32>
    %25 = arith.addf %23, %24 : vector<16x1xf32>
    %26 = math.rsqrt %25 : vector<16x1xf32>
    %27 = vector.broadcast %26 : vector<16x1xf32> to vector<16x32xf32>
    %28 = arith.mulf %18, %27 : vector<16x32xf32>
    %29 = vector.broadcast %11 : vector<1x32xf32> to vector<16x32xf32>
    %30 = arith.mulf %28, %29 : vector<16x32xf32>
    %31 = vector.broadcast %12 : vector<1x32xf32> to vector<16x32xf32>
    %32 = arith.addf %30, %31 : vector<16x32xf32>
    %c0_12 = arith.constant 0 : index
    %c0_13 = arith.constant 0 : index
    %33 = vector.load %arg1[%c0_12, %c0_13] : memref<2x8xf32, #tpu.memory_space<vmem>>, vector<2x8xf32>
    %cst_14 = arith.constant 1.000000e+00 : f32
    %34 = vector.broadcast %cst_14 : f32 to vector<2x8xf32>
    %35 = arith.subf %34, %33 : vector<2x8xf32>
    %cst_15 = arith.constant -1.000000e+09 : f32
    %36 = vector.broadcast %cst_15 : f32 to vector<2x8xf32>
    %37 = arith.mulf %35, %36 : vector<2x8xf32>
    %38 = vector.shape_cast %37 : vector<2x8xf32> to vector<2x1x8xf32>
    %39 = vector.shape_cast %38 : vector<2x1x8xf32> to vector<2x1x8xf32>
    %40 = vector.broadcast %39 : vector<2x1x8xf32> to vector<2x8x8xf32>
    %c0_16 = arith.constant 0 : index
    %c0_17 = arith.constant 0 : index
    %c0_18 = arith.constant 0 : index
    %41 = vector.load %arg5[%c0_16, %c0_17, %c0_18] : memref<2x32x96xf32, #tpu.memory_space<vmem>>, vector<1x32x96xf32>
    %42 = vector.shape_cast %41 : vector<1x32x96xf32> to vector<32x96xf32>
    %cst_19 = arith.constant dense<0.000000e+00> : vector<16x96xf32>
    %43 = tpu.matmul %32, %42, %cst_19 {dimension_numbers = #tpu.dot_dimension_numbers<[1], [0], [0], [1], [0, 0, 1, 1], [], []>} : vector<16x32xf32>, vector<32x96xf32>, vector<16x96xf32> -> vector<16x96xf32>
    %c14 = arith.constant 14 : index
    %c0_20 = arith.constant 0 : index
    %44 = vector.load %arg2[%c14, %c0_20] : memref<30x128xf32, #tpu.memory_space<vmem>>, vector<1x96xf32>
    %45 = vector.broadcast %44 : vector<1x96xf32> to vector<16x96xf32>
    %46 = arith.addf %43, %45 : vector<16x96xf32>
    %c0_21 = arith.constant 0 : index
    %c0_22 = arith.constant 0 : index
    %c0_23 = arith.constant 0 : index
    %47 = vector.load %arg6[%c0_21, %c0_22, %c0_23] : memref<2x32x32xf32, #tpu.memory_space<vmem>>, vector<1x32x32xf32>
    %48 = vector.shape_cast %47 : vector<1x32x32xf32> to vector<32x32xf32>
    %cst_24 = arith.constant 0.000000e+00 : f32
    %49 = vector.broadcast %cst_24 : f32 to vector<16x32xf32>
    %50 = vector.extract_strided_slice %46 {offsets = [0, 0], sizes = [16, 8], strides = [1, 1]} : vector<16x96xf32> to vector<16x8xf32>
    %51 = vector.shape_cast %50 : vector<16x8xf32> to vector<2x8x8xf32>
    %52 = vector.extract_strided_slice %46 {offsets = [0, 32], sizes = [16, 8], strides = [1, 1]} : vector<16x96xf32> to vector<16x8xf32>
    %53 = vector.shape_cast %52 : vector<16x8xf32> to vector<2x8x8xf32>
    %54 = vector.extract_strided_slice %46 {offsets = [0, 64], sizes = [16, 8], strides = [1, 1]} : vector<16x96xf32> to vector<16x8xf32>
    %55 = vector.shape_cast %54 : vector<16x8xf32> to vector<2x8x8xf32>
    "tpu.trace_start"() <{level = 10 : i32, message = "bqd,bkd->bqk"}> : () -> ()
    %cst_25 = arith.constant dense<0.000000e+00> : vector<2x8x8xf32>
    %56 = tpu.matmul %51, %53, %cst_25 {dimension_numbers = #tpu.dot_dimension_numbers<[2], [2], [1], [1], [0, 0, 0, 1, 1, 1], [0], [0]>} : vector<2x8x8xf32>, vector<2x8x8xf32>, vector<2x8x8xf32> -> vector<2x8x8xf32>
    "tpu.trace_stop"() : () -> ()
    %57 = arith.addf %56, %40 : vector<2x8x8xf32>
    %cst_26 = arith.constant dense<0xFF800000> : vector<2x8xf32>
    %58 = vector.multi_reduction <maximumf>, %57, %cst_26 [2] : vector<2x8x8xf32> to vector<2x8xf32>
    %59 = vector.shape_cast %58 : vector<2x8xf32> to vector<2x8x1xf32>
    %60 = vector.broadcast %59 : vector<2x8x1xf32> to vector<2x8x8xf32>
    %61 = arith.subf %57, %60 : vector<2x8x8xf32>
    %62 = math.exp %61 : vector<2x8x8xf32>
    %cst_27 = arith.constant dense<0.000000e+00> : vector<2x8xf32>
    %63 = vector.multi_reduction <add>, %62, %cst_27 [2] : vector<2x8x8xf32> to vector<2x8xf32>
    %64 = vector.shape_cast %63 : vector<2x8xf32> to vector<2x8x1xf32>
    %65 = tpu.reciprocal %64 {approx = true} : vector<2x8x1xf32> -> vector<2x8x1xf32>
    %66 = vector.broadcast %65 : vector<2x8x1xf32> to vector<2x8x8xf32>
    %67 = arith.mulf %62, %66 : vector<2x8x8xf32>
    "tpu.trace_start"() <{level = 10 : i32, message = "bqk,bkd->bqd"}> : () -> ()
    %cst_28 = arith.constant dense<0.000000e+00> : vector<2x8x8xf32>
    %68 = tpu.matmul %67, %55, %cst_28 {dimension_numbers = #tpu.dot_dimension_numbers<[2], [1], [1], [2], [0, 0, 0, 1, 1, 2], [0], [0]>} : vector<2x8x8xf32>, vector<2x8x8xf32>, vector<2x8x8xf32> -> vector<2x8x8xf32>
    "tpu.trace_stop"() : () -> ()
    %69 = vector.shape_cast %68 : vector<2x8x8xf32> to vector<16x8xf32>
    %70 = vector.extract_strided_slice %48 {offsets = [0, 0], sizes = [8, 32], strides = [1, 1]} : vector<32x32xf32> to vector<8x32xf32>
    %cst_29 = arith.constant dense<0.000000e+00> : vector<16x32xf32>
    %71 = tpu.matmul %69, %70, %cst_29 {dimension_numbers = #tpu.dot_dimension_numbers<[1], [0], [0], [1], [0, 0, 1, 1], [], []>} : vector<16x8xf32>, vector<8x32xf32>, vector<16x32xf32> -> vector<16x32xf32>
    %72 = arith.addf %49, %71 : vector<16x32xf32>
    %73 = vector.extract_strided_slice %46 {offsets = [0, 8], sizes = [16, 8], strides = [1, 1]} : vector<16x96xf32> to vector<16x8xf32>
    %74 = vector.shape_cast %73 : vector<16x8xf32> to vector<2x8x8xf32>
    %75 = vector.extract_strided_slice %46 {offsets = [0, 40], sizes = [16, 8], strides = [1, 1]} : vector<16x96xf32> to vector<16x8xf32>
    %76 = vector.shape_cast %75 : vector<16x8xf32> to vector<2x8x8xf32>
    %77 = vector.extract_strided_slice %46 {offsets = [0, 72], sizes = [16, 8], strides = [1, 1]} : vector<16x96xf32> to vector<16x8xf32>
    %78 = vector.shape_cast %77 : vector<16x8xf32> to vector<2x8x8xf32>
    "tpu.trace_start"() <{level = 10 : i32, message = "bqd,bkd->bqk"}> : () -> ()
    %cst_30 = arith.constant dense<0.000000e+00> : vector<2x8x8xf32>
    %79 = tpu.matmul %74, %76, %cst_30 {dimension_numbers = #tpu.dot_dimension_numbers<[2], [2], [1], [1], [0, 0, 0, 1, 1, 1], [0], [0]>} : vector<2x8x8xf32>, vector<2x8x8xf32>, vector<2x8x8xf32> -> vector<2x8x8xf32>
    "tpu.trace_stop"() : () -> ()
    %80 = arith.addf %79, %40 : vector<2x8x8xf32>
    %cst_31 = arith.constant dense<0xFF800000> : vector<2x8xf32>
    %81 = vector.multi_reduction <maximumf>, %80, %cst_31 [2] : vector<2x8x8xf32> to vector<2x8xf32>
    %82 = vector.shape_cast %81 : vector<2x8xf32> to vector<2x8x1xf32>
    %83 = vector.broadcast %82 : vector<2x8x1xf32> to vector<2x8x8xf32>
    %84 = arith.subf %80, %83 : vector<2x8x8xf32>
    %85 = math.exp %84 : vector<2x8x8xf32>
    %cst_32 = arith.constant dense<0.000000e+00> : vector<2x8xf32>
    %86 = vector.multi_reduction <add>, %85, %cst_32 [2] : vector<2x8x8xf32> to vector<2x8xf32>
    %87 = vector.shape_cast %86 : vector<2x8xf32> to vector<2x8x1xf32>
    %88 = tpu.reciprocal %87 {approx = true} : vector<2x8x1xf32> -> vector<2x8x1xf32>
    %89 = vector.broadcast %88 : vector<2x8x1xf32> to vector<2x8x8xf32>
    %90 = arith.mulf %85, %89 : vector<2x8x8xf32>
    "tpu.trace_start"() <{level = 10 : i32, message = "bqk,bkd->bqd"}> : () -> ()
    %cst_33 = arith.constant dense<0.000000e+00> : vector<2x8x8xf32>
    %91 = tpu.matmul %90, %78, %cst_33 {dimension_numbers = #tpu.dot_dimension_numbers<[2], [1], [1], [2], [0, 0, 0, 1, 1, 2], [0], [0]>} : vector<2x8x8xf32>, vector<2x8x8xf32>, vector<2x8x8xf32> -> vector<2x8x8xf32>
    "tpu.trace_stop"() : () -> ()
    %92 = vector.shape_cast %91 : vector<2x8x8xf32> to vector<16x8xf32>
    %93 = vector.extract_strided_slice %48 {offsets = [8, 0], sizes = [8, 32], strides = [1, 1]} : vector<32x32xf32> to vector<8x32xf32>
    %cst_34 = arith.constant dense<0.000000e+00> : vector<16x32xf32>
    %94 = tpu.matmul %92, %93, %cst_34 {dimension_numbers = #tpu.dot_dimension_numbers<[1], [0], [0], [1], [0, 0, 1, 1], [], []>} : vector<16x8xf32>, vector<8x32xf32>, vector<16x32xf32> -> vector<16x32xf32>
    %95 = arith.addf %72, %94 : vector<16x32xf32>
    %96 = vector.extract_strided_slice %46 {offsets = [0, 16], sizes = [16, 8], strides = [1, 1]} : vector<16x96xf32> to vector<16x8xf32>
    %97 = vector.shape_cast %96 : vector<16x8xf32> to vector<2x8x8xf32>
    %98 = vector.extract_strided_slice %46 {offsets = [0, 48], sizes = [16, 8], strides = [1, 1]} : vector<16x96xf32> to vector<16x8xf32>
    %99 = vector.shape_cast %98 : vector<16x8xf32> to vector<2x8x8xf32>
    %100 = vector.extract_strided_slice %46 {offsets = [0, 80], sizes = [16, 8], strides = [1, 1]} : vector<16x96xf32> to vector<16x8xf32>
    %101 = vector.shape_cast %100 : vector<16x8xf32> to vector<2x8x8xf32>
    "tpu.trace_start"() <{level = 10 : i32, message = "bqd,bkd->bqk"}> : () -> ()
    %cst_35 = arith.constant dense<0.000000e+00> : vector<2x8x8xf32>
    %102 = tpu.matmul %97, %99, %cst_35 {dimension_numbers = #tpu.dot_dimension_numbers<[2], [2], [1], [1], [0, 0, 0, 1, 1, 1], [0], [0]>} : vector<2x8x8xf32>, vector<2x8x8xf32>, vector<2x8x8xf32> -> vector<2x8x8xf32>
    "tpu.trace_stop"() : () -> ()
    %103 = arith.addf %102, %40 : vector<2x8x8xf32>
    %cst_36 = arith.constant dense<0xFF800000> : vector<2x8xf32>
    %104 = vector.multi_reduction <maximumf>, %103, %cst_36 [2] : vector<2x8x8xf32> to vector<2x8xf32>
    %105 = vector.shape_cast %104 : vector<2x8xf32> to vector<2x8x1xf32>
    %106 = vector.broadcast %105 : vector<2x8x1xf32> to vector<2x8x8xf32>
    %107 = arith.subf %103, %106 : vector<2x8x8xf32>
    %108 = math.exp %107 : vector<2x8x8xf32>
    %cst_37 = arith.constant dense<0.000000e+00> : vector<2x8xf32>
    %109 = vector.multi_reduction <add>, %108, %cst_37 [2] : vector<2x8x8xf32> to vector<2x8xf32>
    %110 = vector.shape_cast %109 : vector<2x8xf32> to vector<2x8x1xf32>
    %111 = tpu.reciprocal %110 {approx = true} : vector<2x8x1xf32> -> vector<2x8x1xf32>
    %112 = vector.broadcast %111 : vector<2x8x1xf32> to vector<2x8x8xf32>
    %113 = arith.mulf %108, %112 : vector<2x8x8xf32>
    "tpu.trace_start"() <{level = 10 : i32, message = "bqk,bkd->bqd"}> : () -> ()
    %cst_38 = arith.constant dense<0.000000e+00> : vector<2x8x8xf32>
    %114 = tpu.matmul %113, %101, %cst_38 {dimension_numbers = #tpu.dot_dimension_numbers<[2], [1], [1], [2], [0, 0, 0, 1, 1, 2], [0], [0]>} : vector<2x8x8xf32>, vector<2x8x8xf32>, vector<2x8x8xf32> -> vector<2x8x8xf32>
    "tpu.trace_stop"() : () -> ()
    %115 = vector.shape_cast %114 : vector<2x8x8xf32> to vector<16x8xf32>
    %116 = vector.extract_strided_slice %48 {offsets = [16, 0], sizes = [8, 32], strides = [1, 1]} : vector<32x32xf32> to vector<8x32xf32>
    %cst_39 = arith.constant dense<0.000000e+00> : vector<16x32xf32>
    %117 = tpu.matmul %115, %116, %cst_39 {dimension_numbers = #tpu.dot_dimension_numbers<[1], [0], [0], [1], [0, 0, 1, 1], [], []>} : vector<16x8xf32>, vector<8x32xf32>, vector<16x32xf32> -> vector<16x32xf32>
    %118 = arith.addf %95, %117 : vector<16x32xf32>
    %119 = vector.extract_strided_slice %46 {offsets = [0, 24], sizes = [16, 8], strides = [1, 1]} : vector<16x96xf32> to vector<16x8xf32>
    %120 = vector.shape_cast %119 : vector<16x8xf32> to vector<2x8x8xf32>
    %121 = vector.extract_strided_slice %46 {offsets = [0, 56], sizes = [16, 8], strides = [1, 1]} : vector<16x96xf32> to vector<16x8xf32>
    %122 = vector.shape_cast %121 : vector<16x8xf32> to vector<2x8x8xf32>
    %123 = vector.extract_strided_slice %46 {offsets = [0, 88], sizes = [16, 8], strides = [1, 1]} : vector<16x96xf32> to vector<16x8xf32>
    %124 = vector.shape_cast %123 : vector<16x8xf32> to vector<2x8x8xf32>
    "tpu.trace_start"() <{level = 10 : i32, message = "bqd,bkd->bqk"}> : () -> ()
    %cst_40 = arith.constant dense<0.000000e+00> : vector<2x8x8xf32>
    %125 = tpu.matmul %120, %122, %cst_40 {dimension_numbers = #tpu.dot_dimension_numbers<[2], [2], [1], [1], [0, 0, 0, 1, 1, 1], [0], [0]>} : vector<2x8x8xf32>, vector<2x8x8xf32>, vector<2x8x8xf32> -> vector<2x8x8xf32>
    "tpu.trace_stop"() : () -> ()
    %126 = arith.addf %125, %40 : vector<2x8x8xf32>
    %cst_41 = arith.constant dense<0xFF800000> : vector<2x8xf32>
    %127 = vector.multi_reduction <maximumf>, %126, %cst_41 [2] : vector<2x8x8xf32> to vector<2x8xf32>
    %128 = vector.shape_cast %127 : vector<2x8xf32> to vector<2x8x1xf32>
    %129 = vector.broadcast %128 : vector<2x8x1xf32> to vector<2x8x8xf32>
    %130 = arith.subf %126, %129 : vector<2x8x8xf32>
    %131 = math.exp %130 : vector<2x8x8xf32>
    %cst_42 = arith.constant dense<0.000000e+00> : vector<2x8xf32>
    %132 = vector.multi_reduction <add>, %131, %cst_42 [2] : vector<2x8x8xf32> to vector<2x8xf32>
    %133 = vector.shape_cast %132 : vector<2x8xf32> to vector<2x8x1xf32>
    %134 = tpu.reciprocal %133 {approx = true} : vector<2x8x1xf32> -> vector<2x8x1xf32>
    %135 = vector.broadcast %134 : vector<2x8x1xf32> to vector<2x8x8xf32>
    %136 = arith.mulf %131, %135 : vector<2x8x8xf32>
    "tpu.trace_start"() <{level = 10 : i32, message = "bqk,bkd->bqd"}> : () -> ()
    %cst_43 = arith.constant dense<0.000000e+00> : vector<2x8x8xf32>
    %137 = tpu.matmul %136, %124, %cst_43 {dimension_numbers = #tpu.dot_dimension_numbers<[2], [1], [1], [2], [0, 0, 0, 1, 1, 2], [0], [0]>} : vector<2x8x8xf32>, vector<2x8x8xf32>, vector<2x8x8xf32> -> vector<2x8x8xf32>
    "tpu.trace_stop"() : () -> ()
    %138 = vector.shape_cast %137 : vector<2x8x8xf32> to vector<16x8xf32>
    %139 = vector.extract_strided_slice %48 {offsets = [24, 0], sizes = [8, 32], strides = [1, 1]} : vector<32x32xf32> to vector<8x32xf32>
    %cst_44 = arith.constant dense<0.000000e+00> : vector<16x32xf32>
    %140 = tpu.matmul %138, %139, %cst_44 {dimension_numbers = #tpu.dot_dimension_numbers<[1], [0], [0], [1], [0, 0, 1, 1], [], []>} : vector<16x8xf32>, vector<8x32xf32>, vector<16x32xf32> -> vector<16x32xf32>
    %141 = arith.addf %118, %140 : vector<16x32xf32>
    %c15 = arith.constant 15 : index
    %c0_45 = arith.constant 0 : index
    %142 = vector.load %arg2[%c15, %c0_45] : memref<30x128xf32, #tpu.memory_space<vmem>>, vector<1x32xf32>
    %143 = vector.broadcast %142 : vector<1x32xf32> to vector<16x32xf32>
    %144 = arith.addf %141, %143 : vector<16x32xf32>
    %145 = arith.addf %144, %32 : vector<16x32xf32>
    %c16 = arith.constant 16 : index
    %c0_46 = arith.constant 0 : index
    %146 = vector.load %arg2[%c16, %c0_46] : memref<30x128xf32, #tpu.memory_space<vmem>>, vector<1x32xf32>
    %c17 = arith.constant 17 : index
    %c0_47 = arith.constant 0 : index
    %147 = vector.load %arg2[%c17, %c0_47] : memref<30x128xf32, #tpu.memory_space<vmem>>, vector<1x32xf32>
    %cst_48 = arith.constant dense<0.000000e+00> : vector<16xf32>
    %148 = vector.multi_reduction <add>, %145, %cst_48 [1] : vector<16x32xf32> to vector<16xf32>
    %149 = vector.shape_cast %148 : vector<16xf32> to vector<16x1xf32>
    %cst_49 = arith.constant 3.200000e+01 : f32
    %150 = vector.broadcast %cst_49 : f32 to vector<16x1xf32>
    %151 = arith.divf %149, %150 : vector<16x1xf32>
    %152 = vector.broadcast %151 : vector<16x1xf32> to vector<16x32xf32>
    %153 = arith.subf %145, %152 : vector<16x32xf32>
    %154 = arith.mulf %153, %153 : vector<16x32xf32>
    %cst_50 = arith.constant dense<0.000000e+00> : vector<16xf32>
    %155 = vector.multi_reduction <add>, %154, %cst_50 [1] : vector<16x32xf32> to vector<16xf32>
    %156 = vector.shape_cast %155 : vector<16xf32> to vector<16x1xf32>
    %cst_51 = arith.constant 3.200000e+01 : f32
    %157 = vector.broadcast %cst_51 : f32 to vector<16x1xf32>
    %158 = arith.divf %156, %157 : vector<16x1xf32>
    %cst_52 = arith.constant 9.99999996E-13 : f32
    %159 = vector.broadcast %cst_52 : f32 to vector<16x1xf32>
    %160 = arith.addf %158, %159 : vector<16x1xf32>
    %161 = math.rsqrt %160 : vector<16x1xf32>
    %162 = vector.broadcast %161 : vector<16x1xf32> to vector<16x32xf32>
    %163 = arith.mulf %153, %162 : vector<16x32xf32>
    %164 = vector.broadcast %146 : vector<1x32xf32> to vector<16x32xf32>
    %165 = arith.mulf %163, %164 : vector<16x32xf32>
    %166 = vector.broadcast %147 : vector<1x32xf32> to vector<16x32xf32>
    %167 = arith.addf %165, %166 : vector<16x32xf32>
    %c0_53 = arith.constant 0 : index
    %c0_54 = arith.constant 0 : index
    %c0_55 = arith.constant 0 : index
    %168 = vector.load %arg7[%c0_53, %c0_54, %c0_55] : memref<2x32x64xf32, #tpu.memory_space<vmem>>, vector<1x32x64xf32>
    %169 = vector.shape_cast %168 : vector<1x32x64xf32> to vector<32x64xf32>
    %cst_56 = arith.constant dense<0.000000e+00> : vector<16x64xf32>
    %170 = tpu.matmul %167, %169, %cst_56 {dimension_numbers = #tpu.dot_dimension_numbers<[1], [0], [0], [1], [0, 0, 1, 1], [], []>} : vector<16x32xf32>, vector<32x64xf32>, vector<16x64xf32> -> vector<16x64xf32>
    %c18 = arith.constant 18 : index
    %c0_57 = arith.constant 0 : index
    %171 = vector.load %arg2[%c18, %c0_57] : memref<30x128xf32, #tpu.memory_space<vmem>>, vector<1x64xf32>
    %172 = vector.broadcast %171 : vector<1x64xf32> to vector<16x64xf32>
    %173 = arith.addf %170, %172 : vector<16x64xf32>
    %cst_58 = arith.constant 5.000000e-01 : f32
    %174 = vector.broadcast %cst_58 : f32 to vector<16x64xf32>
    %175 = arith.mulf %174, %173 : vector<16x64xf32>
    %cst_59 = arith.constant 0.707106769 : f32
    %176 = vector.broadcast %cst_59 : f32 to vector<16x64xf32>
    %177 = arith.mulf %173, %176 : vector<16x64xf32>
    %178 = math.erf %177 : vector<16x64xf32>
    %cst_60 = arith.constant 1.000000e+00 : f32
    %179 = vector.broadcast %cst_60 : f32 to vector<16x64xf32>
    %180 = arith.addf %179, %178 : vector<16x64xf32>
    %181 = arith.mulf %175, %180 : vector<16x64xf32>
    %c0_61 = arith.constant 0 : index
    %c0_62 = arith.constant 0 : index
    %c0_63 = arith.constant 0 : index
    %182 = vector.load %arg8[%c0_61, %c0_62, %c0_63] : memref<2x64x32xf32, #tpu.memory_space<vmem>>, vector<1x64x32xf32>
    %183 = vector.shape_cast %182 : vector<1x64x32xf32> to vector<64x32xf32>
    %cst_64 = arith.constant dense<0.000000e+00> : vector<16x32xf32>
    %184 = tpu.matmul %181, %183, %cst_64 {dimension_numbers = #tpu.dot_dimension_numbers<[1], [0], [0], [1], [0, 0, 1, 1], [], []>} : vector<16x64xf32>, vector<64x32xf32>, vector<16x32xf32> -> vector<16x32xf32>
    %c19 = arith.constant 19 : index
    %c0_65 = arith.constant 0 : index
    %185 = vector.load %arg2[%c19, %c0_65] : memref<30x128xf32, #tpu.memory_space<vmem>>, vector<1x32xf32>
    %186 = vector.broadcast %185 : vector<1x32xf32> to vector<16x32xf32>
    %187 = arith.addf %184, %186 : vector<16x32xf32>
    %188 = arith.addf %187, %167 : vector<16x32xf32>
    %c20 = arith.constant 20 : index
    %c0_66 = arith.constant 0 : index
    %189 = vector.load %arg2[%c20, %c0_66] : memref<30x128xf32, #tpu.memory_space<vmem>>, vector<1x32xf32>
    %c21 = arith.constant 21 : index
    %c0_67 = arith.constant 0 : index
    %190 = vector.load %arg2[%c21, %c0_67] : memref<30x128xf32, #tpu.memory_space<vmem>>, vector<1x32xf32>
    %cst_68 = arith.constant dense<0.000000e+00> : vector<16xf32>
    %191 = vector.multi_reduction <add>, %188, %cst_68 [1] : vector<16x32xf32> to vector<16xf32>
    %192 = vector.shape_cast %191 : vector<16xf32> to vector<16x1xf32>
    %cst_69 = arith.constant 3.200000e+01 : f32
    %193 = vector.broadcast %cst_69 : f32 to vector<16x1xf32>
    %194 = arith.divf %192, %193 : vector<16x1xf32>
    %195 = vector.broadcast %194 : vector<16x1xf32> to vector<16x32xf32>
    %196 = arith.subf %188, %195 : vector<16x32xf32>
    %197 = arith.mulf %196, %196 : vector<16x32xf32>
    %cst_70 = arith.constant dense<0.000000e+00> : vector<16xf32>
    %198 = vector.multi_reduction <add>, %197, %cst_70 [1] : vector<16x32xf32> to vector<16xf32>
    %199 = vector.shape_cast %198 : vector<16xf32> to vector<16x1xf32>
    %cst_71 = arith.constant 3.200000e+01 : f32
    %200 = vector.broadcast %cst_71 : f32 to vector<16x1xf32>
    %201 = arith.divf %199, %200 : vector<16x1xf32>
    %cst_72 = arith.constant 9.99999996E-13 : f32
    %202 = vector.broadcast %cst_72 : f32 to vector<16x1xf32>
    %203 = arith.addf %201, %202 : vector<16x1xf32>
    %204 = math.rsqrt %203 : vector<16x1xf32>
    %205 = vector.broadcast %204 : vector<16x1xf32> to vector<16x32xf32>
    %206 = arith.mulf %196, %205 : vector<16x32xf32>
    %207 = vector.broadcast %189 : vector<1x32xf32> to vector<16x32xf32>
    %208 = arith.mulf %206, %207 : vector<16x32xf32>
    %209 = vector.broadcast %190 : vector<1x32xf32> to vector<16x32xf32>
    %210 = arith.addf %208, %209 : vector<16x32xf32>
    %c1_73 = arith.constant 1 : index
    %c0_74 = arith.constant 0 : index
    %c0_75 = arith.constant 0 : index
    %211 = vector.load %arg5[%c1_73, %c0_74, %c0_75] : memref<2x32x96xf32, #tpu.memory_space<vmem>>, vector<1x32x96xf32>
    %212 = vector.shape_cast %211 : vector<1x32x96xf32> to vector<32x96xf32>
    %cst_76 = arith.constant dense<0.000000e+00> : vector<16x96xf32>
    %213 = tpu.matmul %210, %212, %cst_76 {dimension_numbers = #tpu.dot_dimension_numbers<[1], [0], [0], [1], [0, 0, 1, 1], [], []>} : vector<16x32xf32>, vector<32x96xf32>, vector<16x96xf32> -> vector<16x96xf32>
    %c22 = arith.constant 22 : index
    %c0_77 = arith.constant 0 : index
    %214 = vector.load %arg2[%c22, %c0_77] : memref<30x128xf32, #tpu.memory_space<vmem>>, vector<1x96xf32>
    %215 = vector.broadcast %214 : vector<1x96xf32> to vector<16x96xf32>
    %216 = arith.addf %213, %215 : vector<16x96xf32>
    %c1_78 = arith.constant 1 : index
    %c0_79 = arith.constant 0 : index
    %c0_80 = arith.constant 0 : index
    %217 = vector.load %arg6[%c1_78, %c0_79, %c0_80] : memref<2x32x32xf32, #tpu.memory_space<vmem>>, vector<1x32x32xf32>
    %218 = vector.shape_cast %217 : vector<1x32x32xf32> to vector<32x32xf32>
    %cst_81 = arith.constant 0.000000e+00 : f32
    %219 = vector.broadcast %cst_81 : f32 to vector<16x32xf32>
    %220 = vector.extract_strided_slice %216 {offsets = [0, 0], sizes = [16, 8], strides = [1, 1]} : vector<16x96xf32> to vector<16x8xf32>
    %221 = vector.shape_cast %220 : vector<16x8xf32> to vector<2x8x8xf32>
    %222 = vector.extract_strided_slice %216 {offsets = [0, 32], sizes = [16, 8], strides = [1, 1]} : vector<16x96xf32> to vector<16x8xf32>
    %223 = vector.shape_cast %222 : vector<16x8xf32> to vector<2x8x8xf32>
    %224 = vector.extract_strided_slice %216 {offsets = [0, 64], sizes = [16, 8], strides = [1, 1]} : vector<16x96xf32> to vector<16x8xf32>
    %225 = vector.shape_cast %224 : vector<16x8xf32> to vector<2x8x8xf32>
    "tpu.trace_start"() <{level = 10 : i32, message = "bqd,bkd->bqk"}> : () -> ()
    %cst_82 = arith.constant dense<0.000000e+00> : vector<2x8x8xf32>
    %226 = tpu.matmul %221, %223, %cst_82 {dimension_numbers = #tpu.dot_dimension_numbers<[2], [2], [1], [1], [0, 0, 0, 1, 1, 1], [0], [0]>} : vector<2x8x8xf32>, vector<2x8x8xf32>, vector<2x8x8xf32> -> vector<2x8x8xf32>
    "tpu.trace_stop"() : () -> ()
    %227 = arith.addf %226, %40 : vector<2x8x8xf32>
    %cst_83 = arith.constant dense<0xFF800000> : vector<2x8xf32>
    %228 = vector.multi_reduction <maximumf>, %227, %cst_83 [2] : vector<2x8x8xf32> to vector<2x8xf32>
    %229 = vector.shape_cast %228 : vector<2x8xf32> to vector<2x8x1xf32>
    %230 = vector.broadcast %229 : vector<2x8x1xf32> to vector<2x8x8xf32>
    %231 = arith.subf %227, %230 : vector<2x8x8xf32>
    %232 = math.exp %231 : vector<2x8x8xf32>
    %cst_84 = arith.constant dense<0.000000e+00> : vector<2x8xf32>
    %233 = vector.multi_reduction <add>, %232, %cst_84 [2] : vector<2x8x8xf32> to vector<2x8xf32>
    %234 = vector.shape_cast %233 : vector<2x8xf32> to vector<2x8x1xf32>
    %235 = tpu.reciprocal %234 {approx = true} : vector<2x8x1xf32> -> vector<2x8x1xf32>
    %236 = vector.broadcast %235 : vector<2x8x1xf32> to vector<2x8x8xf32>
    %237 = arith.mulf %232, %236 : vector<2x8x8xf32>
    "tpu.trace_start"() <{level = 10 : i32, message = "bqk,bkd->bqd"}> : () -> ()
    %cst_85 = arith.constant dense<0.000000e+00> : vector<2x8x8xf32>
    %238 = tpu.matmul %237, %225, %cst_85 {dimension_numbers = #tpu.dot_dimension_numbers<[2], [1], [1], [2], [0, 0, 0, 1, 1, 2], [0], [0]>} : vector<2x8x8xf32>, vector<2x8x8xf32>, vector<2x8x8xf32> -> vector<2x8x8xf32>
    "tpu.trace_stop"() : () -> ()
    %239 = vector.shape_cast %238 : vector<2x8x8xf32> to vector<16x8xf32>
    %240 = vector.extract_strided_slice %218 {offsets = [0, 0], sizes = [8, 32], strides = [1, 1]} : vector<32x32xf32> to vector<8x32xf32>
    %cst_86 = arith.constant dense<0.000000e+00> : vector<16x32xf32>
    %241 = tpu.matmul %239, %240, %cst_86 {dimension_numbers = #tpu.dot_dimension_numbers<[1], [0], [0], [1], [0, 0, 1, 1], [], []>} : vector<16x8xf32>, vector<8x32xf32>, vector<16x32xf32> -> vector<16x32xf32>
    %242 = arith.addf %219, %241 : vector<16x32xf32>
    %243 = vector.extract_strided_slice %216 {offsets = [0, 8], sizes = [16, 8], strides = [1, 1]} : vector<16x96xf32> to vector<16x8xf32>
    %244 = vector.shape_cast %243 : vector<16x8xf32> to vector<2x8x8xf32>
    %245 = vector.extract_strided_slice %216 {offsets = [0, 40], sizes = [16, 8], strides = [1, 1]} : vector<16x96xf32> to vector<16x8xf32>
    %246 = vector.shape_cast %245 : vector<16x8xf32> to vector<2x8x8xf32>
    %247 = vector.extract_strided_slice %216 {offsets = [0, 72], sizes = [16, 8], strides = [1, 1]} : vector<16x96xf32> to vector<16x8xf32>
    %248 = vector.shape_cast %247 : vector<16x8xf32> to vector<2x8x8xf32>
    "tpu.trace_start"() <{level = 10 : i32, message = "bqd,bkd->bqk"}> : () -> ()
    %cst_87 = arith.constant dense<0.000000e+00> : vector<2x8x8xf32>
    %249 = tpu.matmul %244, %246, %cst_87 {dimension_numbers = #tpu.dot_dimension_numbers<[2], [2], [1], [1], [0, 0, 0, 1, 1, 1], [0], [0]>} : vector<2x8x8xf32>, vector<2x8x8xf32>, vector<2x8x8xf32> -> vector<2x8x8xf32>
    "tpu.trace_stop"() : () -> ()
    %250 = arith.addf %249, %40 : vector<2x8x8xf32>
    %cst_88 = arith.constant dense<0xFF800000> : vector<2x8xf32>
    %251 = vector.multi_reduction <maximumf>, %250, %cst_88 [2] : vector<2x8x8xf32> to vector<2x8xf32>
    %252 = vector.shape_cast %251 : vector<2x8xf32> to vector<2x8x1xf32>
    %253 = vector.broadcast %252 : vector<2x8x1xf32> to vector<2x8x8xf32>
    %254 = arith.subf %250, %253 : vector<2x8x8xf32>
    %255 = math.exp %254 : vector<2x8x8xf32>
    %cst_89 = arith.constant dense<0.000000e+00> : vector<2x8xf32>
    %256 = vector.multi_reduction <add>, %255, %cst_89 [2] : vector<2x8x8xf32> to vector<2x8xf32>
    %257 = vector.shape_cast %256 : vector<2x8xf32> to vector<2x8x1xf32>
    %258 = tpu.reciprocal %257 {approx = true} : vector<2x8x1xf32> -> vector<2x8x1xf32>
    %259 = vector.broadcast %258 : vector<2x8x1xf32> to vector<2x8x8xf32>
    %260 = arith.mulf %255, %259 : vector<2x8x8xf32>
    "tpu.trace_start"() <{level = 10 : i32, message = "bqk,bkd->bqd"}> : () -> ()
    %cst_90 = arith.constant dense<0.000000e+00> : vector<2x8x8xf32>
    %261 = tpu.matmul %260, %248, %cst_90 {dimension_numbers = #tpu.dot_dimension_numbers<[2], [1], [1], [2], [0, 0, 0, 1, 1, 2], [0], [0]>} : vector<2x8x8xf32>, vector<2x8x8xf32>, vector<2x8x8xf32> -> vector<2x8x8xf32>
    "tpu.trace_stop"() : () -> ()
    %262 = vector.shape_cast %261 : vector<2x8x8xf32> to vector<16x8xf32>
    %263 = vector.extract_strided_slice %218 {offsets = [8, 0], sizes = [8, 32], strides = [1, 1]} : vector<32x32xf32> to vector<8x32xf32>
    %cst_91 = arith.constant dense<0.000000e+00> : vector<16x32xf32>
    %264 = tpu.matmul %262, %263, %cst_91 {dimension_numbers = #tpu.dot_dimension_numbers<[1], [0], [0], [1], [0, 0, 1, 1], [], []>} : vector<16x8xf32>, vector<8x32xf32>, vector<16x32xf32> -> vector<16x32xf32>
    %265 = arith.addf %242, %264 : vector<16x32xf32>
    %266 = vector.extract_strided_slice %216 {offsets = [0, 16], sizes = [16, 8], strides = [1, 1]} : vector<16x96xf32> to vector<16x8xf32>
    %267 = vector.shape_cast %266 : vector<16x8xf32> to vector<2x8x8xf32>
    %268 = vector.extract_strided_slice %216 {offsets = [0, 48], sizes = [16, 8], strides = [1, 1]} : vector<16x96xf32> to vector<16x8xf32>
    %269 = vector.shape_cast %268 : vector<16x8xf32> to vector<2x8x8xf32>
    %270 = vector.extract_strided_slice %216 {offsets = [0, 80], sizes = [16, 8], strides = [1, 1]} : vector<16x96xf32> to vector<16x8xf32>
    %271 = vector.shape_cast %270 : vector<16x8xf32> to vector<2x8x8xf32>
    "tpu.trace_start"() <{level = 10 : i32, message = "bqd,bkd->bqk"}> : () -> ()
    %cst_92 = arith.constant dense<0.000000e+00> : vector<2x8x8xf32>
    %272 = tpu.matmul %267, %269, %cst_92 {dimension_numbers = #tpu.dot_dimension_numbers<[2], [2], [1], [1], [0, 0, 0, 1, 1, 1], [0], [0]>} : vector<2x8x8xf32>, vector<2x8x8xf32>, vector<2x8x8xf32> -> vector<2x8x8xf32>
    "tpu.trace_stop"() : () -> ()
    %273 = arith.addf %272, %40 : vector<2x8x8xf32>
    %cst_93 = arith.constant dense<0xFF800000> : vector<2x8xf32>
    %274 = vector.multi_reduction <maximumf>, %273, %cst_93 [2] : vector<2x8x8xf32> to vector<2x8xf32>
    %275 = vector.shape_cast %274 : vector<2x8xf32> to vector<2x8x1xf32>
    %276 = vector.broadcast %275 : vector<2x8x1xf32> to vector<2x8x8xf32>
    %277 = arith.subf %273, %276 : vector<2x8x8xf32>
    %278 = math.exp %277 : vector<2x8x8xf32>
    %cst_94 = arith.constant dense<0.000000e+00> : vector<2x8xf32>
    %279 = vector.multi_reduction <add>, %278, %cst_94 [2] : vector<2x8x8xf32> to vector<2x8xf32>
    %280 = vector.shape_cast %279 : vector<2x8xf32> to vector<2x8x1xf32>
    %281 = tpu.reciprocal %280 {approx = true} : vector<2x8x1xf32> -> vector<2x8x1xf32>
    %282 = vector.broadcast %281 : vector<2x8x1xf32> to vector<2x8x8xf32>
    %283 = arith.mulf %278, %282 : vector<2x8x8xf32>
    "tpu.trace_start"() <{level = 10 : i32, message = "bqk,bkd->bqd"}> : () -> ()
    %cst_95 = arith.constant dense<0.000000e+00> : vector<2x8x8xf32>
    %284 = tpu.matmul %283, %271, %cst_95 {dimension_numbers = #tpu.dot_dimension_numbers<[2], [1], [1], [2], [0, 0, 0, 1, 1, 2], [0], [0]>} : vector<2x8x8xf32>, vector<2x8x8xf32>, vector<2x8x8xf32> -> vector<2x8x8xf32>
    "tpu.trace_stop"() : () -> ()
    %285 = vector.shape_cast %284 : vector<2x8x8xf32> to vector<16x8xf32>
    %286 = vector.extract_strided_slice %218 {offsets = [16, 0], sizes = [8, 32], strides = [1, 1]} : vector<32x32xf32> to vector<8x32xf32>
    %cst_96 = arith.constant dense<0.000000e+00> : vector<16x32xf32>
    %287 = tpu.matmul %285, %286, %cst_96 {dimension_numbers = #tpu.dot_dimension_numbers<[1], [0], [0], [1], [0, 0, 1, 1], [], []>} : vector<16x8xf32>, vector<8x32xf32>, vector<16x32xf32> -> vector<16x32xf32>
    %288 = arith.addf %265, %287 : vector<16x32xf32>
    %289 = vector.extract_strided_slice %216 {offsets = [0, 24], sizes = [16, 8], strides = [1, 1]} : vector<16x96xf32> to vector<16x8xf32>
    %290 = vector.shape_cast %289 : vector<16x8xf32> to vector<2x8x8xf32>
    %291 = vector.extract_strided_slice %216 {offsets = [0, 56], sizes = [16, 8], strides = [1, 1]} : vector<16x96xf32> to vector<16x8xf32>
    %292 = vector.shape_cast %291 : vector<16x8xf32> to vector<2x8x8xf32>
    %293 = vector.extract_strided_slice %216 {offsets = [0, 88], sizes = [16, 8], strides = [1, 1]} : vector<16x96xf32> to vector<16x8xf32>
    %294 = vector.shape_cast %293 : vector<16x8xf32> to vector<2x8x8xf32>
    "tpu.trace_start"() <{level = 10 : i32, message = "bqd,bkd->bqk"}> : () -> ()
    %cst_97 = arith.constant dense<0.000000e+00> : vector<2x8x8xf32>
    %295 = tpu.matmul %290, %292, %cst_97 {dimension_numbers = #tpu.dot_dimension_numbers<[2], [2], [1], [1], [0, 0, 0, 1, 1, 1], [0], [0]>} : vector<2x8x8xf32>, vector<2x8x8xf32>, vector<2x8x8xf32> -> vector<2x8x8xf32>
    "tpu.trace_stop"() : () -> ()
    %296 = arith.addf %295, %40 : vector<2x8x8xf32>
    %cst_98 = arith.constant dense<0xFF800000> : vector<2x8xf32>
    %297 = vector.multi_reduction <maximumf>, %296, %cst_98 [2] : vector<2x8x8xf32> to vector<2x8xf32>
    %298 = vector.shape_cast %297 : vector<2x8xf32> to vector<2x8x1xf32>
    %299 = vector.broadcast %298 : vector<2x8x1xf32> to vector<2x8x8xf32>
    %300 = arith.subf %296, %299 : vector<2x8x8xf32>
    %301 = math.exp %300 : vector<2x8x8xf32>
    %cst_99 = arith.constant dense<0.000000e+00> : vector<2x8xf32>
    %302 = vector.multi_reduction <add>, %301, %cst_99 [2] : vector<2x8x8xf32> to vector<2x8xf32>
    %303 = vector.shape_cast %302 : vector<2x8xf32> to vector<2x8x1xf32>
    %304 = tpu.reciprocal %303 {approx = true} : vector<2x8x1xf32> -> vector<2x8x1xf32>
    %305 = vector.broadcast %304 : vector<2x8x1xf32> to vector<2x8x8xf32>
    %306 = arith.mulf %301, %305 : vector<2x8x8xf32>
    "tpu.trace_start"() <{level = 10 : i32, message = "bqk,bkd->bqd"}> : () -> ()
    %cst_100 = arith.constant dense<0.000000e+00> : vector<2x8x8xf32>
    %307 = tpu.matmul %306, %294, %cst_100 {dimension_numbers = #tpu.dot_dimension_numbers<[2], [1], [1], [2], [0, 0, 0, 1, 1, 2], [0], [0]>} : vector<2x8x8xf32>, vector<2x8x8xf32>, vector<2x8x8xf32> -> vector<2x8x8xf32>
    "tpu.trace_stop"() : () -> ()
    %308 = vector.shape_cast %307 : vector<2x8x8xf32> to vector<16x8xf32>
    %309 = vector.extract_strided_slice %218 {offsets = [24, 0], sizes = [8, 32], strides = [1, 1]} : vector<32x32xf32> to vector<8x32xf32>
    %cst_101 = arith.constant dense<0.000000e+00> : vector<16x32xf32>
    %310 = tpu.matmul %308, %309, %cst_101 {dimension_numbers = #tpu.dot_dimension_numbers<[1], [0], [0], [1], [0, 0, 1, 1], [], []>} : vector<16x8xf32>, vector<8x32xf32>, vector<16x32xf32> -> vector<16x32xf32>
    %311 = arith.addf %288, %310 : vector<16x32xf32>
    %c23 = arith.constant 23 : index
    %c0_102 = arith.constant 0 : index
    %312 = vector.load %arg2[%c23, %c0_102] : memref<30x128xf32, #tpu.memory_space<vmem>>, vector<1x32xf32>
    %313 = vector.broadcast %312 : vector<1x32xf32> to vector<16x32xf32>
    %314 = arith.addf %311, %313 : vector<16x32xf32>
    %315 = arith.addf %314, %210 : vector<16x32xf32>
    %c24 = arith.constant 24 : index
    %c0_103 = arith.constant 0 : index
    %316 = vector.load %arg2[%c24, %c0_103] : memref<30x128xf32, #tpu.memory_space<vmem>>, vector<1x32xf32>
    %c25 = arith.constant 25 : index
    %c0_104 = arith.constant 0 : index
    %317 = vector.load %arg2[%c25, %c0_104] : memref<30x128xf32, #tpu.memory_space<vmem>>, vector<1x32xf32>
    %cst_105 = arith.constant dense<0.000000e+00> : vector<16xf32>
    %318 = vector.multi_reduction <add>, %315, %cst_105 [1] : vector<16x32xf32> to vector<16xf32>
    %319 = vector.shape_cast %318 : vector<16xf32> to vector<16x1xf32>
    %cst_106 = arith.constant 3.200000e+01 : f32
    %320 = vector.broadcast %cst_106 : f32 to vector<16x1xf32>
    %321 = arith.divf %319, %320 : vector<16x1xf32>
    %322 = vector.broadcast %321 : vector<16x1xf32> to vector<16x32xf32>
    %323 = arith.subf %315, %322 : vector<16x32xf32>
    %324 = arith.mulf %323, %323 : vector<16x32xf32>
    %cst_107 = arith.constant dense<0.000000e+00> : vector<16xf32>
    %325 = vector.multi_reduction <add>, %324, %cst_107 [1] : vector<16x32xf32> to vector<16xf32>
    %326 = vector.shape_cast %325 : vector<16xf32> to vector<16x1xf32>
    %cst_108 = arith.constant 3.200000e+01 : f32
    %327 = vector.broadcast %cst_108 : f32 to vector<16x1xf32>
    %328 = arith.divf %326, %327 : vector<16x1xf32>
    %cst_109 = arith.constant 9.99999996E-13 : f32
    %329 = vector.broadcast %cst_109 : f32 to vector<16x1xf32>
    %330 = arith.addf %328, %329 : vector<16x1xf32>
    %331 = math.rsqrt %330 : vector<16x1xf32>
    %332 = vector.broadcast %331 : vector<16x1xf32> to vector<16x32xf32>
    %333 = arith.mulf %323, %332 : vector<16x32xf32>
    %334 = vector.broadcast %316 : vector<1x32xf32> to vector<16x32xf32>
    %335 = arith.mulf %333, %334 : vector<16x32xf32>
    %336 = vector.broadcast %317 : vector<1x32xf32> to vector<16x32xf32>
    %337 = arith.addf %335, %336 : vector<16x32xf32>
    %c1_110 = arith.constant 1 : index
    %c0_111 = arith.constant 0 : index
    %c0_112 = arith.constant 0 : index
    %338 = vector.load %arg7[%c1_110, %c0_111, %c0_112] : memref<2x32x64xf32, #tpu.memory_space<vmem>>, vector<1x32x64xf32>
    %339 = vector.shape_cast %338 : vector<1x32x64xf32> to vector<32x64xf32>
    %cst_113 = arith.constant dense<0.000000e+00> : vector<16x64xf32>
    %340 = tpu.matmul %337, %339, %cst_113 {dimension_numbers = #tpu.dot_dimension_numbers<[1], [0], [0], [1], [0, 0, 1, 1], [], []>} : vector<16x32xf32>, vector<32x64xf32>, vector<16x64xf32> -> vector<16x64xf32>
    %c26 = arith.constant 26 : index
    %c0_114 = arith.constant 0 : index
    %341 = vector.load %arg2[%c26, %c0_114] : memref<30x128xf32, #tpu.memory_space<vmem>>, vector<1x64xf32>
    %342 = vector.broadcast %341 : vector<1x64xf32> to vector<16x64xf32>
    %343 = arith.addf %340, %342 : vector<16x64xf32>
    %cst_115 = arith.constant 5.000000e-01 : f32
    %344 = vector.broadcast %cst_115 : f32 to vector<16x64xf32>
    %345 = arith.mulf %344, %343 : vector<16x64xf32>
    %cst_116 = arith.constant 0.707106769 : f32
    %346 = vector.broadcast %cst_116 : f32 to vector<16x64xf32>
    %347 = arith.mulf %343, %346 : vector<16x64xf32>
    %348 = math.erf %347 : vector<16x64xf32>
    %cst_117 = arith.constant 1.000000e+00 : f32
    %349 = vector.broadcast %cst_117 : f32 to vector<16x64xf32>
    %350 = arith.addf %349, %348 : vector<16x64xf32>
    %351 = arith.mulf %345, %350 : vector<16x64xf32>
    %c1_118 = arith.constant 1 : index
    %c0_119 = arith.constant 0 : index
    %c0_120 = arith.constant 0 : index
    %352 = vector.load %arg8[%c1_118, %c0_119, %c0_120] : memref<2x64x32xf32, #tpu.memory_space<vmem>>, vector<1x64x32xf32>
    %353 = vector.shape_cast %352 : vector<1x64x32xf32> to vector<64x32xf32>
    %cst_121 = arith.constant dense<0.000000e+00> : vector<16x32xf32>
    %354 = tpu.matmul %351, %353, %cst_121 {dimension_numbers = #tpu.dot_dimension_numbers<[1], [0], [0], [1], [0, 0, 1, 1], [], []>} : vector<16x64xf32>, vector<64x32xf32>, vector<16x32xf32> -> vector<16x32xf32>
    %c27 = arith.constant 27 : index
    %c0_122 = arith.constant 0 : index
    %355 = vector.load %arg2[%c27, %c0_122] : memref<30x128xf32, #tpu.memory_space<vmem>>, vector<1x32xf32>
    %356 = vector.broadcast %355 : vector<1x32xf32> to vector<16x32xf32>
    %357 = arith.addf %354, %356 : vector<16x32xf32>
    %358 = arith.addf %357, %337 : vector<16x32xf32>
    %c28 = arith.constant 28 : index
    %c0_123 = arith.constant 0 : index
    %359 = vector.load %arg2[%c28, %c0_123] : memref<30x128xf32, #tpu.memory_space<vmem>>, vector<1x32xf32>
    %c29 = arith.constant 29 : index
    %c0_124 = arith.constant 0 : index
    %360 = vector.load %arg2[%c29, %c0_124] : memref<30x128xf32, #tpu.memory_space<vmem>>, vector<1x32xf32>
    %cst_125 = arith.constant dense<0.000000e+00> : vector<16xf32>
    %361 = vector.multi_reduction <add>, %358, %cst_125 [1] : vector<16x32xf32> to vector<16xf32>
    %362 = vector.shape_cast %361 : vector<16xf32> to vector<16x1xf32>
    %cst_126 = arith.constant 3.200000e+01 : f32
    %363 = vector.broadcast %cst_126 : f32 to vector<16x1xf32>
    %364 = arith.divf %362, %363 : vector<16x1xf32>
    %365 = vector.broadcast %364 : vector<16x1xf32> to vector<16x32xf32>
    %366 = arith.subf %358, %365 : vector<16x32xf32>
    %367 = arith.mulf %366, %366 : vector<16x32xf32>
    %cst_127 = arith.constant dense<0.000000e+00> : vector<16xf32>
    %368 = vector.multi_reduction <add>, %367, %cst_127 [1] : vector<16x32xf32> to vector<16xf32>
    %369 = vector.shape_cast %368 : vector<16xf32> to vector<16x1xf32>
    %cst_128 = arith.constant 3.200000e+01 : f32
    %370 = vector.broadcast %cst_128 : f32 to vector<16x1xf32>
    %371 = arith.divf %369, %370 : vector<16x1xf32>
    %cst_129 = arith.constant 9.99999996E-13 : f32
    %372 = vector.broadcast %cst_129 : f32 to vector<16x1xf32>
    %373 = arith.addf %371, %372 : vector<16x1xf32>
    %374 = math.rsqrt %373 : vector<16x1xf32>
    %375 = vector.broadcast %374 : vector<16x1xf32> to vector<16x32xf32>
    %376 = arith.mulf %366, %375 : vector<16x32xf32>
    %377 = vector.broadcast %359 : vector<1x32xf32> to vector<16x32xf32>
    %378 = arith.mulf %376, %377 : vector<16x32xf32>
    %379 = vector.broadcast %360 : vector<1x32xf32> to vector<16x32xf32>
    %380 = arith.addf %378, %379 : vector<16x32xf32>
    %c0_130 = arith.constant 0 : index
    %c0_131 = arith.constant 0 : index
    %381 = vector.load %arg9[%c0_130, %c0_131] : memref<32x32xf32, #tpu.memory_space<vmem>>, vector<32x32xf32>
    %cst_132 = arith.constant dense<0.000000e+00> : vector<16x32xf32>
    %382 = tpu.matmul %380, %381, %cst_132 {dimension_numbers = #tpu.dot_dimension_numbers<[1], [0], [0], [1], [0, 0, 1, 1], [], []>} : vector<16x32xf32>, vector<32x32xf32>, vector<16x32xf32> -> vector<16x32xf32>
    %c2 = arith.constant 2 : index
    %c0_133 = arith.constant 0 : index
    %383 = vector.load %arg2[%c2, %c0_133] : memref<30x128xf32, #tpu.memory_space<vmem>>, vector<1x32xf32>
    %384 = vector.broadcast %383 : vector<1x32xf32> to vector<16x32xf32>
    %385 = arith.addf %382, %384 : vector<16x32xf32>
    %cst_134 = arith.constant 5.000000e-01 : f32
    %386 = vector.broadcast %cst_134 : f32 to vector<16x32xf32>
    %387 = arith.mulf %386, %385 : vector<16x32xf32>
    %cst_135 = arith.constant 0.707106769 : f32
    %388 = vector.broadcast %cst_135 : f32 to vector<16x32xf32>
    %389 = arith.mulf %385, %388 : vector<16x32xf32>
    %390 = math.erf %389 : vector<16x32xf32>
    %cst_136 = arith.constant 1.000000e+00 : f32
    %391 = vector.broadcast %cst_136 : f32 to vector<16x32xf32>
    %392 = arith.addf %391, %390 : vector<16x32xf32>
    %393 = arith.mulf %387, %392 : vector<16x32xf32>
    %c3 = arith.constant 3 : index
    %c0_137 = arith.constant 0 : index
    %394 = vector.load %arg2[%c3, %c0_137] : memref<30x128xf32, #tpu.memory_space<vmem>>, vector<1x32xf32>
    %c4 = arith.constant 4 : index
    %c0_138 = arith.constant 0 : index
    %395 = vector.load %arg2[%c4, %c0_138] : memref<30x128xf32, #tpu.memory_space<vmem>>, vector<1x32xf32>
    %cst_139 = arith.constant dense<0.000000e+00> : vector<16xf32>
    %396 = vector.multi_reduction <add>, %393, %cst_139 [1] : vector<16x32xf32> to vector<16xf32>
    %397 = vector.shape_cast %396 : vector<16xf32> to vector<16x1xf32>
    %cst_140 = arith.constant 3.200000e+01 : f32
    %398 = vector.broadcast %cst_140 : f32 to vector<16x1xf32>
    %399 = arith.divf %397, %398 : vector<16x1xf32>
    %400 = vector.broadcast %399 : vector<16x1xf32> to vector<16x32xf32>
    %401 = arith.subf %393, %400 : vector<16x32xf32>
    %402 = arith.mulf %401, %401 : vector<16x32xf32>
    %cst_141 = arith.constant dense<0.000000e+00> : vector<16xf32>
    %403 = vector.multi_reduction <add>, %402, %cst_141 [1] : vector<16x32xf32> to vector<16xf32>
    %404 = vector.shape_cast %403 : vector<16xf32> to vector<16x1xf32>
    %cst_142 = arith.constant 3.200000e+01 : f32
    %405 = vector.broadcast %cst_142 : f32 to vector<16x1xf32>
    %406 = arith.divf %404, %405 : vector<16x1xf32>
    %cst_143 = arith.constant 9.99999996E-13 : f32
    %407 = vector.broadcast %cst_143 : f32 to vector<16x1xf32>
    %408 = arith.addf %406, %407 : vector<16x1xf32>
    %409 = math.rsqrt %408 : vector<16x1xf32>
    %410 = vector.broadcast %409 : vector<16x1xf32> to vector<16x32xf32>
    %411 = arith.mulf %401, %410 : vector<16x32xf32>
    %412 = vector.broadcast %394 : vector<1x32xf32> to vector<16x32xf32>
    %413 = arith.mulf %411, %412 : vector<16x32xf32>
    %414 = vector.broadcast %395 : vector<1x32xf32> to vector<16x32xf32>
    %415 = arith.addf %413, %414 : vector<16x32xf32>
    %c0_144 = arith.constant 0 : index
    %c0_145 = arith.constant 0 : index
    %416 = vector.load %arg4[%c0_144, %c0_145] : memref<32x128xf32, #tpu.memory_space<vmem>>, vector<32x128xf32>
    %cst_146 = arith.constant dense<0.000000e+00> : vector<16x128xf32>
    %417 = tpu.matmul %415, %416, %cst_146 {dimension_numbers = #tpu.dot_dimension_numbers<[1], [0], [0], [1], [0, 0, 1, 1], [], []>} : vector<16x32xf32>, vector<32x128xf32>, vector<16x128xf32> -> vector<16x128xf32>
    %c5 = arith.constant 5 : index
    %c0_147 = arith.constant 0 : index
    %418 = vector.load %arg2[%c5, %c0_147] : memref<30x128xf32, #tpu.memory_space<vmem>>, vector<1x128xf32>
    %419 = vector.broadcast %418 : vector<1x128xf32> to vector<16x128xf32>
    %420 = arith.addf %417, %419 : vector<16x128xf32>
    %c0_148 = arith.constant 0 : index
    %c0_149 = arith.constant 0 : index
    %421 = vector.load %arg10[%c0_148, %c0_149] : memref<16x128xf32, #tpu.memory_space<vmem>>, vector<16x128xf32>
    tpu.vector_store %arg10[%c0_148, %c0_149], %420 {strides = array<i32>} : memref<16x128xf32, #tpu.memory_space<vmem>>, vector<16x128xf32>,
    return
  }
}

</mosaic_0001>

<bundles_post_ra>
// kernel: nlp_model_forward.1
= control target key start
LH: loop header
LB: loop body
LE: loop exit
PB: predicated region body
PF: predicated region fallthrough
CT: control target
= control target key end

     0   :  { %v5421_v2 = vmov 0   ;;  %s6159_s0 = inlined_call_operand.vmem [shape: s32[16,1], index: 0, kind: input, shape index: {}]   ;;  %s6160_s1 = inlined_call_operand.vmem [shape: f32[2,8], index: 1, kind: input, shape index: {}]   ;;  %s6161_s2 = inlined_call_operand.vmem [shape: f32[30,128], index: 2, kind: input, shape index: {}]   ;;  %s6162_s3 = inlined_call_operand.vmem [shape: f32[128,32], index: 3, kind: input, shape index: {}]   ;;  %s6163_s4 = inlined_call_operand.vmem [shape: f32[32,128], index: 4, kind: input, shape index: {}]   ;;  %s6164_s5 = inlined_call_operand.vmem [shape: f32[2,32,96], index: 5, kind: input, shape index: {}]   ;;  %s6165_s6 = inlined_call_operand.vmem [shape: f32[2,32,32], index: 6, kind: input, shape index: {}]   ;;  %s6166_s7 = inlined_call_operand.vmem [shape: f32[2,32,64], index: 7, kind: input, shape index: {}]   ;;  %s6167_s8 = inlined_call_operand.vmem [shape: f32[2,64,32], index: 8, kind: input, shape index: {}]   ;;  %s6168_s9 = inlined_call_operand.vmem [shape: f32[32,32], index: 9, kind: input, shape index: {}]   ;;  %s6169_s10 = inlined_call_operand.hbm [shape: f32[16,128], index: 10, kind: output, shape index: {}]  }
   0x1   :  { %v36_v0 = vld [vmem:[%s6159_s0] sm:$0xff]  ;;  %5296 = vset.pattern.permute.xlu0 %v5421_v2  ;;  %v53_v3 = vld [vmem:[%s6162_s3 + $0x8] sm:$0xff]  ;;  %v54_v4 = vld [vmem:[%s6162_s3 + $0x10] sm:$0xff] }
   0x2   :  { %v52_v1 = vld [vmem:[%s6162_s3] sm:$0xff]  ;;  %v55_v5 = vld [vmem:[%s6162_s3 + $0x18] sm:$0xff]  ;;  %41 = vperm.xlu0 %5296, %v36_v0   ;;  %v37_v8 = vld [vmem:[%s6159_s0 + $0x8] sm:$0xff] }
   0x3   :  { %v5153_v6 = vpack.c.bf16 %v53_v3, %v52_v1  ;;  %v5157_v7 = vpack.c.bf16 %v55_v5, %v54_v4  ;;  %v56_v9 = vld [vmem:[%s6162_s3 + $0x20] sm:$0xff]  ;;  %v57_v10 = vld [vmem:[%s6162_s3 + $0x28] sm:$0xff] }
   0x4   :  { %v5161_v11 = vpack.c.bf16 %v57_v10, %v56_v9 }
   0x5   :  { %5154 = vmatprep.subr.bf16.mxu0 %v5153_v6 }
   0x6   :  { %5156 = vmatpush3.bf16.msra.mxu0 %v5153_v6  ;;  %44 = vperm.xlu0 %5296, %v37_v8  }
   0x7   :  { %5158 = vmatprep.subr.bf16.mxu0 %v5157_v7 }
   0x8   :  { %15 = vsyncpa [#allocation3], 0  ;;  %v58_v12 = vld [vmem:[%s6162_s3 + $0x30] sm:$0xff]  ;;  %v59_v13 = vld [vmem:[%s6162_s3 + $0x38] sm:$0xff]  ;;  %v38_v27 = vlaneseq  ;;  %v5422_v30 = vmov 1.0   ;;  %vm146_vm2 = vcmask 261120  }
   0x9   :  { %v5165_v14 = vpack.c.bf16 %v59_v13, %v58_v12  ;;  %v60_v15 = vld [vmem:[%s6162_s3 + $0x40] sm:$0xff]  ;;  %v61_v16 = vld [vmem:[%s6162_s3 + $0x48] sm:$0xff]  ;;  %v62_v18 = vld [vmem:[%s6162_s3 + $0x50] sm:$0xff]  ;;  %vm5424_vm3 = vmmov 0   ;;  %s5425_s22 = smov 64   ;;  %s5426_s23 = smov 96  }
   0xa   :  { %5160 = vmatpush3.bf16.msra.mxu0 %v5157_v7  ;;  %v5169_v17 = vpack.c.bf16 %v61_v16, %v60_v15  ;;  %v63_v19 = vld [vmem:[%s6162_s3 + $0x58] sm:$0xff]  ;;  %v64_v21 = vld [vmem:[%s6162_s3 + $0x60] sm:$0xff]  ;;  %v65_v22 = vld [vmem:[%s6162_s3 + $0x68] sm:$0xff]  ;;  %v39_v28 = vand.u32 127, %v38_v27  ;;  %v5423_v7 = vmov 0.0   ;;  %vm319_vm4 = vcmask 64512  }
   0xb   :  { %5162 = vmatprep.subr.bf16.mxu0 %v5161_v11  ;;  %v5173_v20 = vpack.c.bf16 %v63_v19, %v62_v18  ;;  %v5177_v23 = vpack.c.bf16 %v65_v22, %v64_v21  ;;  %v66_v24 = vld [vmem:[%s6162_s3 + $0x70] sm:$0xff]  ;;  %v67_v25 = vld [vmem:[%s6162_s3 + $0x78] sm:$0xff]  ;;  %v68_v32 = vld [vmem:[%s6161_s2 + $0x6] sm:$0xff]  ;;  %v5427_v16 = vmov 1966171168   ;;  %v194_v21 = vshrl.u32 %v38_v27, 7 }
   0xc   :  { %v5181_v26 = vpack.c.bf16 %v67_v25, %v66_v24  ;;  %v222_v49 = vld [vmem:[%s6164_s5] sm:$0xff]  ;;  %v223_v50 = vld [vmem:[%s6164_s5 + $0x8] sm:$0xff]  ;;  %v224_v51 = vld [vmem:[%s6164_s5 + $0x10] sm:$0xff]  ;;  %s5429_s26 = smov 120   ;;  %s5430_s27 = smov 80   ;;  %vm2125_vm5 = vcmask 523264  }
   0xd   :  { %v5185_v52 = vpack.c.bf16 %v223_v50, %v222_v49  ;;  %v225_v53 = vld [vmem:[%s6164_s5 + $0x18] sm:$0xff]  ;;  %v4530_v62 = vld [vmem:[%s6161_s2] ss:$0 sm:$0xff]  ;;  %v4531_v0 = vld [vmem:[%s6161_s2 + $0x1] ss:$0 sm:$0xff]  ;;  %s5431_s28 = smov 112  }
   0xe   :  { %5164 = vmatpush3.bf16.msra.mxu0 %v5161_v11  ;;  %v5189_v54 = vpack.c.bf16 %v225_v53, %v224_v51  ;;  %v4532_v8 = vld [vmem:[%s6161_s2 + $0xe] ss:$0 sm:$0xff]  ;;  %v186_v18 = vld [vmem:[%s6160_s1] sm:$0x3]  ;;  %s5428_s1 = smov 88   ;;  %s5432_s29 = smov 56  }
   0xf   :  { %5166 = vmatprep.subr.bf16.mxu0 %v5165_v14  ;;  %5186 = vmatprep.subr.bf16.mxu1 %v5185_v52  ;;  %v187_v19 = vsub.f32 1.0, %v186_v18  ;;  %s5433_s3 = smov 48   ;;  %s5434_s30 = smov 72  }
  0x10   :  { %5188 = vmatpush3.bf16.msra.mxu1 %v5185_v52  ;;  %s5435_s11 = smov 104   ;;  %s5436_s17 = smov 40  }
  0x11   :  { %5190 = vmatprep.subr.bf16.mxu1 %v5189_v54  ;;  %v188_v22 = vmul.f32 -1e+09, %v187_v19  ;;  %s5437_s21 = smov [#allocation2]  }
  0x12   :  { %5168 = vmatpush3.bf16.msra.mxu0 %v5165_v14  ;;  %s4515_s24 = sshll.u32 %s5437_s21, 4  ;;  %s4516_s24 = int_to_ptr.vmem [resolvable:$true] %s4515_s24 }
  0x13   :  { %5170 = vmatprep.subr.bf16.mxu0 %v5169_v17  ;;  %s5397_s25 = scalar_lea.vmem %s4516_s24, 256  ;;  %p5402_p1 = scmp.lt.s32.totalorder %s4516_s24, %s4516_s24 }
  0x14   :  { %5192 = vmatpush3.bf16.msra.mxu1 %v5189_v54  ;;  %p5398_p0 = scmp.ne.s32.totalorder %s4516_s24, %s5397_s25  ;;  %p5403_p2 = scmp.lt.s32.totalorder %s5397_s25, %s5397_s25 }
  0x15   :  { %4860 = vmatprep.subr.mxu1 %v5423_v7 }
  0x16   :  { %5172 = vmatpush3.bf16.msra.mxu0 %v5169_v17  ;;  %v191_v17 = vunpack.c.l.s4 %v5427_v16  ;;  %p5404_p3 = por %p5403_p2, %p5402_p1 }
  0x17   :  { %5174 = vmatprep.subr.bf16.mxu0 %v5173_v20 }
  0x18   :  { %p5405_p4 = pnand %p5404_p3, %p5398_p0 }
  0x1a   :  { %5176 = vmatpush3.bf16.msra.mxu0 %v5173_v20  ;;  %v192_v20 = vunpack.c.0.s8 %v191_v17 }
  0x1b   :  { %5178 = vmatprep.subr.bf16.mxu0 %v5177_v23 }
  0x1e   :  { %5180 = vmatpush3.bf16.msra.mxu0 %v5177_v23  ;;  %v195_v23 = vsub.s32 %v192_v20, %v194_v21 }
  0x1f   :  { %5182 = vmatprep.subr.bf16.mxu0 %v5181_v26 }
  0x20   :  { %v196_v24 = vrot.slane %v188_v22, %v195_v23 }
  0x22   :  { %5184 = vmatpush3.bf16.msra.mxu0 %v5181_v26  ;;  %v197_v25 = vcombine.high %v196_v24, %v196_v24  ;;  %v204_v26 = vrot.slane %v196_v24, %v195_v23 }
  0x23   :  { %4890 = vmatprep.subr.mxu0 %v5423_v7 }
  0x81   :  { %v42_v29 = vpop.permute.xlu0 %41 }
  0x82   :  { %vm46_vm0 = vcmp.eq.s32.totalorder %v42_v29, %v39_v28  ;;  %v211_v29 = vrot.slane %v197_v25, %v195_v23 }
  0x83   :  { %4846 = vmatprep.mubr.msk.f32.mxu0 %vm46_vm0, %v5422_v30 }
  0x85   :  { %v45_v31 = vpop.permute.xlu0 %44 }
  0x86   :  { %vm47_vm1 = vcmp.eq.s32.totalorder %v45_v31, %v39_v28  ;;  %v214_v28 = vsub.s32 0, %v194_v21 }
  0x87   :  { %4847 = vmatmul.mubr.msk.f32.vlgmr.msra.gmra.mrb[0].mxu0 %vm47_vm1, %v5422_v30 }
  0x88   :  { %4892 = vmatprep.mubr.msk.f32.mxu0 %vm5424_vm3, %v5423_v7  ;;  %v5619_v30 = vrot.slane %v204_v26, %v214_v28 }
 0x15a   :  { %v4848_v33 = vpop.f32.mrb[0].mxu0 }
 0x15b   :  { %v135_v34 = vpop.f32.mrb[1].mxu0  ;;  %v141_v36 = vadd.f32 %v4848_v33, %v68_v32 }
 0x15c   :  { %v136_v35 = vadd.f32 %v135_v34, %v68_v32  ;;  %v5621_v32 = vrot.slane %v211_v29, %v214_v28 }
 0x15d   :  { %v150_v38 = vsel %vm146_vm2, %v141_v36, 0.0 }
 0x15e   :  { %v147_v37 = vsel %vm146_vm2, %v136_v35, 0.0 }
 0x15f   :  { %148 = vadd.xlane.f32.xlu1 %v147_v37 }
 0x163   :  { %151 = vadd.xlane.f32.xlu1 %v150_v38 }
 0x1ec   :  { %v149_v39 = vpop.xlane.xlu1 %148 }
 0x1ed   :  { %v154_v40 = vmul.f32 0.03125, %v149_v39 }
 0x1ef   :  { %v156_v41 = vsub.f32 %v136_v35, %v154_v40 }
 0x1f0   :  { %v152_v42 = vpop.xlane.xlu1 %151 }
 0x1f1   :  { %v155_v43 = vmul.f32 0.03125, %v152_v42  ;;  %v158_v44 = vmul.f32 %v156_v41, %v156_v41 }
 0x1f3   :  { %v157_v45 = vsub.f32 %v141_v36, %v155_v43  ;;  %v160_v46 = vsel %vm146_vm2, %v158_v44, 0.0 }
 0x1f4   :  { %161 = vadd.xlane.f32.xlu0 %v160_v46 }
 0x1f5   :  { %v159_v47 = vmul.f32 %v157_v45, %v157_v45 }
 0x1f7   :  { %v163_v48 = vsel %vm146_vm2, %v159_v47, 0.0 }
 0x1f8   :  { %164 = vadd.xlane.f32.xlu1 %v163_v48 }
 0x281   :  { %v162_v55 = vpop.xlane.xlu0 %161 }
 0x282   :  { %v166_v56 = vmul.f32 0.03125, %v162_v55 }
 0x284   :  { %v168_v57 = vadd.f32 1e-12, %v166_v56 }
 0x285   :  { %v165_v58 = vpop.xlane.xlu1 %164 }
 0x286   :  { %5297 = vrsqrt.f32 %v168_v57  ;;  %v167_v59 = vmul.f32 0.03125, %v165_v58 }
 0x288   :  { %v169_v60 = vadd.f32 1e-12, %v167_v59 }
 0x28a   :  { %5299 = vrsqrt.f32 %v169_v60 }
 0x290   :  { %v5298_v61 = vpop.eup %5297 }
 0x291   :  { %v172_v63 = vmul.f32 %v5298_v61, %v156_v41 }
 0x293   :  { %v178_v1 = vmul.f32 %v4530_v62, %v172_v63 }
 0x294   :  { %v5300_v2 = vpop.eup %5299 }
 0x295   :  { %v173_v3 = vmul.f32 %v5300_v2, %v157_v45  ;;  %v5575_v4 = vadd.f32 %v4531_v0, %v178_v1 }
 0x297   :  { %v179_v5 = vmul.f32 %v4530_v62, %v173_v3  ;;  %4857 = vmatprep.mubr.msk.f32.mxu1 %vm146_vm2, %v5575_v4 }
 0x299   :  { %v5579_v6 = vadd.f32 %v4531_v0, %v179_v5 }
 0x29b   :  { %4858 = vmatmul.mubr.msk.f32.vlgmr.msra.gmra.mrb[0].mxu1 %vm146_vm2, %v5579_v6 }
 0x29c   :  { %4862 = vmatprep.mubr.msk.f32.mxu1 %vm5424_vm3, %v5423_v7 }
 0x36e   :  { %v4859_v9 = vpop.f32.mrb[0].mxu1 }
 0x36f   :  { %v303_v10 = vpop.f32.mrb[1].mxu1  ;;  %v5598_v12 = vadd.f32 %v4859_v9, %v4532_v8 }
 0x370   :  { %v5592_v11 = vadd.f32 %v4532_v8, %v303_v10 }
 0x372   :  { %493 = vrot.lane.b32.xlu0 %v5592_v11, %s5425_s22  ;;  %317 = vrot.lane.b32.xlu1 %v5592_v11, %s5426_s23 }
 0x376   :  { %395 = vrot.lane.b32.xlu1 %v5598_v12, %s5426_s23 }
 0x3e4   :  { %v318_v13 = vpop.permute.xlu1 %317  ;;  %v494_v15 = vpop.permute.xlu0 %493 }
 0x3e5   :  { %4861 = vmatpush3.xpose.msk.msra.mxu1 %vm319_vm4, %v318_v13 }
 0x3e6   :  { %4865 = vmatprep.subr.mxu1 %v5423_v7 }
 0x3e8   :  { %4863 = vmatmul.mubr.msk.f32.vlgmr.msra.gmra.mrb[2].mxu1 %vm319_vm4, %v5592_v11  ;;  %v396_v14 = vpop.permute.xlu1 %395 }
 0x3e9   :  { %4866 = vmatpush3.xpose.msk.msra.mxu1 %vm319_vm4, %v396_v14  ;;  %4867 = vmatprep.mubr.msk.f32.mxu1 %vm5424_vm3, %v5423_v7 }
 0x3ea   :  { %4870 = vmatprep.subr.mxu1 %v5423_v7 }
 0x3ec   :  { %4868 = vmatmul.mubr.msk.f32.vlgmr.msra.gmra.mrb[4].mxu1 %vm319_vm4, %v5598_v12 }
 0x3ed   :  { %4871 = vmatpush3.msra.mxu1 %v494_v15  ;;  %4872 = vmatprep.mubr.msk.f32.mxu1 %vm5424_vm3, %v5423_v7 }
 0x3ee   :  { %4875 = vmatprep.subr.mxu1 %v5423_v7 }
 0x4bb   :  { %v390_v31 = vpop.f32.mrb[2].mxu1 }
 0x4bc   :  { %v391_v33 = vadd.f32 %v390_v31, %v5619_v30  ;;  %v4864_v34 = vpop.f32.mrb[3].mxu1 }
 0x4be   :  { %v471_v35 = vsel %vm319_vm4, %v391_v33, -inf }
 0x4bf   :  { %472 = vmax.xlane.f32.xlu1 %v471_v35  ;;  %v467_v36 = vpop.f32.mrb[4].mxu1 }
 0x4c0   :  { %v468_v27 = vadd.f32 %v467_v36, %v5621_v32  ;;  %v4869_v37 = vpop.f32.mrb[5].mxu1 }
 0x4c2   :  { %v474_v38 = vsel %vm319_vm4, %v468_v27, -inf }
 0x4c3   :  { %475 = vmax.xlane.f32.xlu0 %v474_v38 }
 0x4d0   :  { %569 = vrot.lane.b32.xlu1 %v5598_v12, %s5425_s22 }
 0x4d9   :  { %647 = vrot.lane.b32.xlu0 %v5592_v11, %s5428_s1 }
 0x54c   :  { %v473_v39 = vpop.xlane.xlu1 %472 }
 0x54d   :  { %v477_v40 = vsub.f32 %v391_v33, %v473_v39 }
 0x54f   :  { %v479_v41 = vmul.f32 1.442695, %v477_v40 }
 0x550   :  { %v476_v44 = vpop.xlane.xlu0 %475  ;;  %v570_v53 = vpop.permute.xlu1 %569 }
 0x551   :  { %5301 = vpow2.f32 %v479_v41  ;;  %v478_v45 = vsub.f32 %v468_v27, %v476_v44 }
 0x553   :  { %v481_v46 = vmul.f32 1.442695, %v478_v45 }
 0x554   :  { %v648_v49 = vpop.permute.xlu0 %647 }
 0x555   :  { %5303 = vpow2.f32 %v481_v46 }
 0x55b   :  { %v5302_v42 = vpop.eup %5301 }
 0x55c   :  { %v483_v43 = vsel %vm319_vm4, %v5302_v42, 0.0 }
 0x55d   :  { %484 = vadd.xlane.f32.xlu0 %v483_v43 }
 0x55f   :  { %v5304_v47 = vpop.eup %5303 }
 0x560   :  { %v486_v48 = vsel %vm319_vm4, %v5304_v47, 0.0 }
 0x573   :  { %645 = vrot.lane.b32.xlu0 %v5592_v11, %s5429_s26 }
 0x592   :  { %487 = vadd.xlane.f32.xlu0 %v486_v48  ;;  %v312_v48 = vld [vmem:[%s6165_s6] sm:$0xff] }
 0x5a8   :  { %725 = vrot.lane.b32.xlu0 %v5598_v12, %s5428_s1 }
 0x5ac   :  { %723 = vrot.lane.b32.xlu0 %v5598_v12, %s5429_s26 }
 0x5ea   :  { %v485_v50 = vpop.xlane.xlu0 %484 }
 0x5eb   :  { %5305 = vrcp.f32 %v485_v50 }
 0x5ee   :  { %v646_v54 = vpop.permute.xlu0 %645 }
 0x5f5   :  { %v5306_v51 = vpop.eup %5305 }
 0x5f6   :  { %v491_v52 = vmul.f32 %v5306_v51, %v5302_v42 }
 0x5f8   :  { %4873 = vmatmul.mubr.msk.f32.vlgmr.msra.gmra.mrb[6].mxu1 %vm319_vm4, %v491_v52 }
 0x5f9   :  { %4876 = vmatpush3.msra.mxu1 %v570_v53  ;;  %4877 = vmatprep.mubr.msk.f32.mxu1 %vm5424_vm3, %v5423_v7 }
 0x5fa   :  { %4880 = vmatprep.subr.mxu1 %v5423_v7 }
 0x61f   :  { %v488_v55 = vpop.xlane.xlu0 %487 }
 0x620   :  { %5307 = vrcp.f32 %v488_v55 }
 0x623   :  { %v726_v58 = vpop.permute.xlu0 %725 }
 0x627   :  { %v724_v59 = vpop.permute.xlu0 %723 }
 0x62a   :  { %v5308_v56 = vpop.eup %5307 }
 0x62b   :  { %v492_v57 = vmul.f32 %v5308_v56, %v5304_v47  ;;  %v313_v47 = vld [vmem:[%s6165_s6 + $0x8] sm:$0xff] }
 0x62d   :  { %4878 = vmatmul.mubr.msk.f32.vlgmr.msra.gmra.mrb[8].mxu1 %vm319_vm4, %v492_v57 }
 0x62e   :  { %4881 = vmatpush3.xpose.msk.msra.mxu1 %vm319_vm4, %v648_v49  ;;  %4882 = vmatprep.mubr.msk.f32.mxu1 %vm5424_vm3, %v5423_v7 }
 0x62f   :  { %4885 = vmatprep.subr.mxu1 %v5423_v7 }
 0x631   :  { %4883 = vmatmul.mubr.msk.f32.vlgmr.msra.gmra.mrb[10].mxu1 %vm319_vm4, %v646_v54 }
 0x632   :  { %4886 = vmatpush3.xpose.msk.msra.mxu1 %vm319_vm4, %v726_v58  ;;  %4887 = vmatprep.mubr.msk.f32.mxu1 %vm5424_vm3, %v5423_v7 }
 0x633   :  { %4895 = vmatprep.subr.mxu1 %v5423_v7 }
 0x635   :  { %4888 = vmatmul.mubr.msk.f32.vlgmr.msra.gmra.mrb[12].mxu1 %vm319_vm4, %v724_v59 }
 0x636   :  { %4897 = vmatprep.mubr.msk.f32.mxu1 %vm5424_vm3, %v5423_v7 }
 0x6cb   :  { %v5656_v60 = vpop.f32.mrb[6].mxu1 }
 0x6cc   :  { %v4874_v61 = vpop.f32.mrb[7].mxu1 }
 0x700   :  { %v5658_v62 = vpop.f32.mrb[8].mxu1 }
 0x701   :  { %v4879_v63 = vpop.f32.mrb[9].mxu1 }
 0x702   :  { %v314_v63 = vld [vmem:[%s6165_s6 + $0x10] sm:$0xff] }
 0x704   :  { %v719_v0 = vpop.f32.mrb[10].mxu1 }
 0x705   :  { %v4884_v1 = vpop.f32.mrb[11].mxu1  ;;  %v720_v16 = vadd.f32 %v719_v0, %v5619_v30 }
 0x707   :  { %v801_v17 = vsel %vm319_vm4, %v720_v16, -inf }
 0x708   :  { %v797_v2 = vpop.f32.mrb[12].mxu1 }
 0x709   :  { %v798_v3 = vadd.f32 %v797_v2, %v5621_v32  ;;  %v4889_v5 = vpop.f32.mrb[13].mxu1 }
 0x70b   :  { %v804_v8 = vsel %vm319_vm4, %v798_v3, -inf }
 0x70c   :  { %805 = vmax.xlane.f32.xlu1 %v804_v8 }
 0x71d   :  { %1139 = vrot.lane.b32.xlu1 %v5592_v11, %s5430_s27 }
 0x721   :  { %1137 = vrot.lane.b32.xlu1 %v5592_v11, %s5431_s28 }
 0x725   :  { %1215 = vrot.lane.b32.xlu1 %v5598_v12, %s5431_s28 }
 0x799   :  { %v806_v9 = vpop.xlane.xlu1 %805 }
 0x79a   :  { %v808_v10 = vsub.f32 %v798_v3, %v806_v9 }
 0x79c   :  { %v811_v13 = vmul.f32 1.442695, %v808_v10 }
 0x79d   :  { %v1140_v20 = vpop.permute.xlu1 %1139 }
 0x79e   :  { %5309 = vpow2.f32 %v811_v13 }
 0x7a1   :  { %v1138_v23 = vpop.permute.xlu1 %1137 }
 0x7a5   :  { %v1216_v25 = vpop.permute.xlu1 %1215 }
 0x7a8   :  { %v5310_v14 = vpop.eup %5309 }
 0x7a9   :  { %v816_v15 = vsel %vm319_vm4, %v5310_v14, 0.0 }
 0x7aa   :  { %817 = vadd.xlane.f32.xlu0 %v816_v15 }
 0x7c0   :  { %899 = vrot.lane.b32.xlu0 %v5598_v12, %s5432_s29 }
 0x7c4   :  { %1217 = vrot.lane.b32.xlu0 %v5598_v12, %s5430_s27 }
 0x7e3   :  { %802 = vmax.xlane.f32.xlu0 %v801_v17 }
 0x7f9   :  { %823 = vrot.lane.b32.xlu0 %v5592_v11, %s5432_s29 }
 0x7fd   :  { %1315 = vrot.lane.b32.xlu0 %v5592_v11, %s5433_s3 }
 0x801   :  { %1552 = vrot.lane.b32.xlu0 %v5592_v11, %s5434_s30 }
 0x805   :  { %1630 = vrot.lane.b32.xlu0 %v5598_v12, %s5434_s30 }
 0x809   :  { %1550 = vrot.lane.b32.xlu0 %v5592_v11, %s5435_s11 }
 0x80d   :  { %1628 = vrot.lane.b32.xlu0 %v5598_v12, %s5435_s11 }
 0x837   :  { %v818_v18 = vpop.xlane.xlu0 %817 }
 0x838   :  { %5311 = vrcp.f32 %v818_v18 }
 0x83b   :  { %v900_v19 = vpop.permute.xlu0 %899 }
 0x83c   :  { %4896 = vmatpush3.msra.mxu1 %v900_v19 }
 0x83d   :  { %4910 = vmatprep.subr.mxu1 %v5423_v7 }
 0x83f   :  { %v1218_v24 = vpop.permute.xlu0 %1217 }
 0x842   :  { %v5312_v21 = vpop.eup %5311 }
 0x843   :  { %v822_v22 = vmul.f32 %v5312_v21, %v5310_v14 }
 0x845   :  { %4898 = vmatmul.mubr.msk.f32.vlgmr.msra.gmra.mrb[14].mxu1 %vm319_vm4, %v822_v22 }
 0x846   :  { %4911 = vmatpush3.xpose.msk.msra.mxu1 %vm319_vm4, %v1140_v20  ;;  %4912 = vmatprep.mubr.msk.f32.mxu1 %vm5424_vm3, %v5423_v7 }
 0x847   :  { %4915 = vmatprep.subr.mxu1 %v5423_v7 }
 0x849   :  { %4913 = vmatmul.mubr.msk.f32.vlgmr.msra.gmra.mrb[16].mxu1 %vm319_vm4, %v1138_v23 }
 0x84a   :  { %4916 = vmatpush3.xpose.msk.msra.mxu1 %vm319_vm4, %v1218_v24  ;;  %4917 = vmatprep.mubr.msk.f32.mxu1 %vm5424_vm3, %v5423_v7 }
 0x84b   :  { %4925 = vmatprep.subr.mxu1 %v5423_v7 }
 0x84d   :  { %4918 = vmatmul.mubr.msk.f32.vlgmr.msra.gmra.mrb[18].mxu1 %vm319_vm4, %v1216_v25 }
 0x84e   :  { %4927 = vmatprep.mubr.msk.f32.mxu1 %vm5424_vm3, %v5423_v7 }
 0x870   :  { %v803_v26 = vpop.xlane.xlu0 %802 }
 0x871   :  { %v807_v28 = vsub.f32 %v720_v16, %v803_v26 }
 0x873   :  { %v809_v29 = vmul.f32 1.442695, %v807_v28 }
 0x874   :  { %v824_v31 = vpop.permute.xlu0 %823 }
 0x875   :  { %5313 = vpow2.f32 %v809_v29  ;;  %4891 = vmatpush3.msra.mxu0 %v824_v31 }
 0x876   :  { %4900 = vmatprep.subr.mxu0 %v313_v47 }
 0x878   :  { %v1316_v0 = vpop.permute.xlu0 %1315 }
 0x87c   :  { %v1553_v3 = vpop.permute.xlu0 %1552 }
 0x87f   :  { %v5314_v33 = vpop.eup %5313 }
 0x880   :  { %v813_v34 = vsel %vm319_vm4, %v5314_v33, 0.0 }
 0x881   :  { %814 = vadd.xlane.f32.xlu1 %v813_v34 }
 0x90e   :  { %v815_v35 = vpop.xlane.xlu1 %814 }
 0x90f   :  { %5315 = vrcp.f32 %v815_v35 }
 0x918   :  { %v971_v36 = vpop.f32.mrb[14].mxu1 }
 0x919   :  { %v5316_v27 = vpop.eup %5315  ;;  %v4899_v37 = vpop.f32.mrb[15].mxu1 }
 0x91a   :  { %v821_v38 = vmul.f32 %v5316_v27, %v5314_v33 }
 0x91c   :  { %4893 = vmatmul.mubr.msk.f32.vlgmr.msra.gmra.mrb[2].mxu0 %vm319_vm4, %v821_v38  ;;  %v1211_v39 = vpop.f32.mrb[16].mxu1 }
 0x91d   :  { %v1212_v40 = vadd.f32 %v1211_v39, %v5619_v30  ;;  %v4914_v41 = vpop.f32.mrb[17].mxu1  ;;  %4901 = vmatpush3.msra.mxu0 %v313_v47 }
 0x91e   :  { %4905 = vmatprep.subr.mxu0 %v312_v48 }
 0x91f   :  { %v1293_v42 = vsel %vm319_vm4, %v1212_v40, -inf }
 0x920   :  { %1294 = vmax.xlane.f32.xlu1 %v1293_v42  ;;  %v1289_v43 = vpop.f32.mrb[18].mxu1 }
 0x921   :  { %v1290_v44 = vadd.f32 %v1289_v43, %v5621_v32  ;;  %v4919_v45 = vpop.f32.mrb[19].mxu1  ;;  %v315_v43 = vld [vmem:[%s6165_s6 + $0x18] sm:$0xff] }
 0x923   :  { %v1296_v46 = vsel %vm319_vm4, %v1290_v44, -inf }
 0x924   :  { %1297 = vmax.xlane.f32.xlu1 %v1296_v46 }
 0x9ad   :  { %v1295_v49 = vpop.xlane.xlu1 %1294 }
 0x9ae   :  { %v1299_v50 = vsub.f32 %v1212_v40, %v1295_v49 }
 0x9b0   :  { %v1301_v51 = vmul.f32 1.442695, %v1299_v50  ;;  %v4567_v50 = vld [vmem:[%s6161_s2 + $0xf] ss:$0 sm:$0xff] }
 0x9b1   :  { %v1298_v52 = vpop.xlane.xlu1 %1297 }
 0x9b2   :  { %5317 = vpow2.f32 %v1301_v51  ;;  %v1300_v53 = vsub.f32 %v1290_v44, %v1298_v52 }
 0x9b4   :  { %v1303_v54 = vmul.f32 1.442695, %v1300_v53 }
 0x9b6   :  { %5319 = vpow2.f32 %v1303_v54 }
 0x9bc   :  { %v5318_v55 = vpop.eup %5317 }
 0x9bd   :  { %v1305_v56 = vsel %vm319_vm4, %v5318_v55, 0.0 }
 0x9be   :  { %1306 = vadd.xlane.f32.xlu1 %v1305_v56 }
 0x9c0   :  { %v5320_v57 = vpop.eup %5319 }
 0x9c1   :  { %v1308_v58 = vsel %vm319_vm4, %v5320_v57, 0.0 }
 0x9c2   :  { %1309 = vadd.xlane.f32.xlu1 %v1308_v58 }
 0x9d3   :  { %1391 = vrot.lane.b32.xlu1 %v5598_v12, %s5433_s3 }
 0x9ef   :  { %v895_v59 = vpop.f32.mrb[2].mxu0 }
 0x9f0   :  { %v4894_v61 = vpop.f32.mrb[3].mxu0  ;;  %4902 = vmatprep.mubr.msk.f32.mxu0 %vm319_vm4, %v895_v59 }
 0x9f1   :  { %4903 = vmatmul.mubr.msk.f32.vlgmr.msra.gmra.mrb[4].mxu0 %vm319_vm4, %v971_v36 }
 0x9f2   :  { %4907 = vmatprep.mubr.msk.f32.mxu0 %vm319_vm4, %v5656_v60  ;;  %4906 = vmatpush3.msra.mxu0 %v312_v48 }
 0x9f3   :  { %4920 = vmatprep.subr.mxu0 %v5423_v7 }
 0x9f9   :  { %4908 = vmatmul.mubr.msk.f32.vlgmr.msra.gmra.mrb[4].mxu0 %vm319_vm4, %v5658_v62  ;;  %v1631_v62 = vpop.permute.xlu0 %1630 }
 0x9fa   :  { %4921 = vmatpush3.msra.mxu0 %v1316_v0  ;;  %4922 = vmatprep.mubr.msk.f32.mxu0 %vm5424_vm3, %v5423_v7 }
 0x9fb   :  { %4930 = vmatprep.subr.mxu0 %v314_v63 }
 0x9fd   :  { %v1551_v13 = vpop.permute.xlu0 %1550 }
 0xa01   :  { %v1629_v18 = vpop.permute.xlu0 %1628 }
 0xa4b   :  { %v1307_v1 = vpop.xlane.xlu1 %1306 }
 0xa4c   :  { %5321 = vrcp.f32 %v1307_v1 }
 0xa4f   :  { %v1310_v2 = vpop.xlane.xlu1 %1309 }
 0xa50   :  { %5323 = vrcp.f32 %v1310_v2 }
 0xa53   :  { %v1392_v60 = vpop.permute.xlu1 %1391 }
 0xa54   :  { %4926 = vmatpush3.msra.mxu1 %v1392_v60 }
 0xa55   :  { %4935 = vmatprep.subr.mxu1 %v5423_v7 }
 0xa56   :  { %v5322_v5 = vpop.eup %5321 }
 0xa57   :  { %v1313_v8 = vmul.f32 %v5322_v5, %v5318_v55 }
 0xa59   :  { %4923 = vmatmul.mubr.msk.f32.vlgmr.msra.gmra.mrb[6].mxu0 %vm319_vm4, %v1313_v8  ;;  %v2013_v8 = vld [vmem:[%s6166_s7 + $0x8] sm:$0xff] }
 0xa5a   :  { %v5324_v9 = vpop.eup %5323  ;;  %4931 = vmatpush3.msra.mxu0 %v314_v63 }
 0xa5b   :  { %v1314_v10 = vmul.f32 %v5324_v9, %v5320_v57  ;;  %4940 = vmatprep.subr.mxu0 %v5423_v7 }
 0xa5d   :  { %4928 = vmatmul.mubr.msk.f32.vlgmr.msra.gmra.mrb[20].mxu1 %vm319_vm4, %v1314_v10  ;;  %v2015_v10 = vld [vmem:[%s6166_s7 + $0x18] sm:$0xff] }
 0xa5e   :  { %4936 = vmatpush3.xpose.msk.msra.mxu1 %vm319_vm4, %v1553_v3  ;;  %4937 = vmatprep.mubr.msk.f32.mxu1 %vm5424_vm3, %v5423_v7 }
 0xa5f   :  { %4945 = vmatprep.subr.mxu1 %v5423_v7 }
 0xa61   :  { %4938 = vmatmul.mubr.msk.f32.vlgmr.msra.gmra.mrb[22].mxu1 %vm319_vm4, %v1551_v13 }
 0xa62   :  { %4947 = vmatprep.mubr.msk.f32.mxu1 %vm5424_vm3, %v5423_v7 }
 0xb2c   :  { %v1387_v14 = vpop.f32.mrb[6].mxu0 }
 0xb2d   :  { %v4924_v15 = vpop.f32.mrb[7].mxu0  ;;  %4932 = vmatprep.mubr.msk.f32.mxu0 %vm319_vm4, %v1387_v14 }
 0xb30   :  { %v1463_v16 = vpop.f32.mrb[20].mxu1 }
 0xb31   :  { %v4929_v17 = vpop.f32.mrb[21].mxu1  ;;  %4933 = vmatmul.mubr.msk.f32.vlgmr.msra.gmra.mrb[4].mxu0 %vm319_vm4, %v1463_v16 }
 0xb32   :  { %4941 = vmatpush3.xpose.msk.msra.mxu0 %vm319_vm4, %v1631_v62  ;;  %4942 = vmatprep.mubr.msk.f32.mxu0 %vm5424_vm3, %v5423_v7  ;;  %v2014_v62 = vld [vmem:[%s6166_s7 + $0x10] sm:$0xff] }
 0xb33   :  { %4950 = vmatprep.subr.mxu0 %v5423_v7  ;;  %v5197_v13 = vpack.c.bf16 %v2015_v10, %v2014_v62 }
 0xb34   :  { %v1624_v19 = vpop.f32.mrb[22].mxu1 }
 0xb35   :  { %v1625_v20 = vadd.f32 %v1624_v19, %v5619_v30  ;;  %v4939_v21 = vpop.f32.mrb[23].mxu1  ;;  %4943 = vmatmul.mubr.msk.f32.vlgmr.msra.gmra.mrb[8].mxu0 %vm319_vm4, %v1629_v18 }
 0xb36   :  { %4952 = vmatprep.mubr.msk.f32.mxu0 %vm5424_vm3, %v5423_v7  ;;  %v4568_v21 = vld [vmem:[%s6161_s2 + $0x10] ss:$0 sm:$0xff] }
 0xb37   :  { %v1706_v22 = vsel %vm319_vm4, %v1625_v20, -inf }
 0xb38   :  { %1707 = vmax.xlane.f32.xlu1 %v1706_v22 }
 0xbc5   :  { %v1708_v23 = vpop.xlane.xlu1 %1707 }
 0xbc6   :  { %v1712_v24 = vsub.f32 %v1625_v20, %v1708_v23 }
 0xbc8   :  { %v1714_v25 = vmul.f32 1.442695, %v1712_v24 }
 0xbca   :  { %5325 = vpow2.f32 %v1714_v25  ;;  %v4569_v25 = vld [vmem:[%s6161_s2 + $0x11] ss:$0 sm:$0xff] }
 0xbd4   :  { %v5326_v33 = vpop.eup %5325 }
 0xbd5   :  { %v1718_v34 = vsel %vm319_vm4, %v5326_v33, 0.0 }
 0xc08   :  { %v1702_v26 = vpop.f32.mrb[8].mxu0 }
 0xc09   :  { %v1703_v28 = vadd.f32 %v1702_v26, %v5621_v32  ;;  %v4944_v29 = vpop.f32.mrb[9].mxu0 }
 0xc0b   :  { %v1709_v31 = vsel %vm319_vm4, %v1703_v28, -inf }
 0xc0c   :  { %1710 = vmax.xlane.f32.xlu0 %v1709_v31 }
 0xc10   :  { %1719 = vadd.xlane.f32.xlu0 %v1718_v34  ;;  %v2113_v34 = vld [vmem:[%s6167_s8 + $0x8] sm:$0xff] }
 0xc26   :  { %1728 = vrot.lane.b32.xlu0 %v5592_v11, %s5436_s17 }
 0xc99   :  { %v1711_v35 = vpop.xlane.xlu0 %1710 }
 0xc9a   :  { %v1713_v36 = vsub.f32 %v1703_v28, %v1711_v35 }
 0xc9c   :  { %v1716_v27 = vmul.f32 1.442695, %v1713_v36  ;;  %v2114_v36 = vld [vmem:[%s6167_s8 + $0x10] sm:$0xff] }
 0xc9d   :  { %v1720_v37 = vpop.xlane.xlu0 %1719 }
 0xc9e   :  { %5327 = vpow2.f32 %v1716_v27  ;;  %v2115_v27 = vld [vmem:[%s6167_s8 + $0x18] sm:$0xff] }
 0xc9f   :  { %5329 = vrcp.f32 %v1720_v37  ;;  %v5205_v37 = vpack.c.bf16 %v2115_v27, %v2114_v36 }
 0xca1   :  { %v1729_v38 = vpop.permute.xlu0 %1728 }
 0xca2   :  { %4946 = vmatpush3.msra.mxu1 %v1729_v38  ;;  %v2116_v38 = vld [vmem:[%s6167_s8 + $0x20] sm:$0xff] }
 0xca8   :  { %v5328_v39 = vpop.eup %5327 }
 0xca9   :  { %v5330_v40 = vpop.eup %5329  ;;  %v1721_v41 = vsel %vm319_vm4, %v5328_v39, 0.0 }
 0xcaa   :  { %v1726_v42 = vmul.f32 %v5330_v40, %v5326_v33  ;;  %1722 = vadd.xlane.f32.xlu1 %v1721_v41  ;;  %v2112_v33 = vld [vmem:[%s6167_s8] sm:$0xff]  ;;  %v2118_v41 = vld [vmem:[%s6167_s8 + $0x30] sm:$0xff] }
 0xcab   :  { %v5201_v35 = vpack.c.bf16 %v2113_v34, %v2112_v33 }
 0xcac   :  { %4948 = vmatmul.mubr.msk.f32.vlgmr.msra.gmra.mrb[24].mxu1 %vm319_vm4, %v1726_v42  ;;  %v2119_v42 = vld [vmem:[%s6167_s8 + $0x38] sm:$0xff] }
 0xcbb   :  { %1804 = vrot.lane.b32.xlu1 %v5598_v12, %s5436_s17 }
 0xd37   :  { %v1723_v11 = vpop.xlane.xlu1 %1722 }
 0xd38   :  { %5331 = vrcp.f32 %v1723_v11  ;;  %v5213_v11 = vpack.c.bf16 %v2119_v42, %v2118_v41 }
 0xd3b   :  { %v1805_v44 = vpop.permute.xlu1 %1804 }
 0xd3c   :  { %4951 = vmatpush3.msra.mxu0 %v1805_v44 }
 0xd3d   :  { %4955 = vmatprep.subr.mxu0 %v315_v43 }
 0xd42   :  { %v5332_v45 = vpop.eup %5331 }
 0xd43   :  { %v1727_v46 = vmul.f32 %v5332_v45, %v5328_v39  ;;  %v2117_v39 = vld [vmem:[%s6167_s8 + $0x28] sm:$0xff] }
 0xd44   :  { %v5209_v40 = vpack.c.bf16 %v2117_v39, %v2116_v38  ;;  %v4582_v39 = vld [vmem:[%s6161_s2 + $0x16] ss:$0 sm:$0xff] }
 0xd45   :  { %4953 = vmatmul.mubr.msk.f32.vlgmr.msra.gmra.mrb[10].mxu0 %vm319_vm4, %v1727_v46 }
 0xd46   :  { %4956 = vmatpush3.msra.mxu0 %v315_v43  ;;  %v4570_v43 = vld [vmem:[%s6161_s2 + $0x12] ss:$0 sm:$0xff] }
 0xd47   :  { %5202 = vmatprep.subr.bf16.mxu0 %v5201_v35 }
 0xd7f   :  { %v1800_v47 = vpop.f32.mrb[24].mxu1 }
 0xd80   :  { %v4949_v48 = vpop.f32.mrb[25].mxu1  ;;  %4957 = vmatprep.mubr.msk.f32.mxu0 %vm319_vm4, %v1800_v47 }
 0xe18   :  { %v1876_v49 = vpop.f32.mrb[10].mxu0 }
 0xe19   :  { %v4954_v12 = vpop.f32.mrb[11].mxu0  ;;  %4958 = vmatmul.mubr.msk.f32.vlgmr.msra.gmra.mrb[4].mxu0 %vm319_vm4, %v1876_v49 }
 0xe1a   :  { %5204 = vmatpush3.bf16.msra.mxu0 %v5201_v35  ;;  %v4577_v35 = vld [vmem:[%s6161_s2 + $0x15] ss:$0 sm:$0xff] }
 0xe1b   :  { %5206 = vmatprep.subr.bf16.mxu0 %v5205_v37 }
 0xe1e   :  { %5208 = vmatpush3.bf16.msra.mxu0 %v5205_v37 }
 0xe1f   :  { %5210 = vmatprep.subr.bf16.mxu0 %v5209_v40 }
 0xe22   :  { %5212 = vmatpush3.bf16.msra.mxu0 %v5209_v40 }
 0xe23   :  { %5214 = vmatprep.subr.bf16.mxu0 %v5213_v11 }
 0xe26   :  { %5216 = vmatpush3.bf16.msra.mxu0 %v5213_v11 }
 0xe27   :  { %5011 = vmatprep.subr.mxu0 %v5423_v7 }
 0xeec   :  { %v4959_v51 = vpop.f32.mrb[4].mxu0 }
 0xeed   :  { %v1969_v52 = vadd.f32 %v4959_v51, %v4567_v50  ;;  %v1952_v53 = vpop.f32.mrb[5].mxu0 }
 0xeee   :  { %v1968_v54 = vadd.f32 %v4567_v50, %v1952_v53 }
 0xeef   :  { %v1971_v55 = vadd.f32 %v1969_v52, %v5579_v6 }
 0xef0   :  { %v1970_v56 = vadd.f32 %v1968_v54, %v5575_v4  ;;  %v2012_v4 = vld [vmem:[%s6166_s7] sm:$0xff] }
 0xef1   :  { %v1977_v57 = vsel %vm146_vm2, %v1971_v55, 0.0  ;;  %v5193_v9 = vpack.c.bf16 %v2013_v8, %v2012_v4 }
 0xef2   :  { %1978 = vadd.xlane.f32.xlu0 %v1977_v57  ;;  %v1974_v58 = vsel %vm146_vm2, %v1970_v56, 0.0  ;;  %v4573_v57 = vld [vmem:[%s6161_s2 + $0x13] ss:$0 sm:$0xff] }
 0xef3   :  { %1975 = vadd.xlane.f32.xlu1 %v1974_v58  ;;  %5194 = vmatprep.subr.bf16.mxu1 %v5193_v9 }
 0xef4   :  { %5196 = vmatpush3.bf16.msra.mxu1 %v5193_v9 }
 0xef5   :  { %5198 = vmatprep.subr.bf16.mxu1 %v5197_v13 }
 0xef8   :  { %5200 = vmatpush3.bf16.msra.mxu1 %v5197_v13 }
 0xf7f   :  { %v1979_v59 = vpop.xlane.xlu0 %1978 }
 0xf80   :  { %v1981_v61 = vmul.f32 0.03125, %v1979_v59  ;;  %v1976_v63 = vpop.xlane.xlu1 %1975 }
 0xf81   :  { %v1980_v0 = vmul.f32 0.03125, %v1976_v63 }
 0xf82   :  { %v1983_v1 = vsub.f32 %v1971_v55, %v1981_v61 }
 0xf83   :  { %v1982_v2 = vsub.f32 %v1970_v56, %v1980_v0 }
 0xf84   :  { %v1985_v60 = vmul.f32 %v1983_v1, %v1983_v1 }
 0xf85   :  { %v1984_v3 = vmul.f32 %v1982_v2, %v1982_v2 }
 0xf86   :  { %v1989_v5 = vsel %vm146_vm2, %v1985_v60, 0.0 }
 0xf87   :  { %1990 = vadd.xlane.f32.xlu1 %v1989_v5  ;;  %v1986_v6 = vsel %vm146_vm2, %v1984_v3, 0.0 }
 0xf88   :  { %1987 = vadd.xlane.f32.xlu0 %v1986_v6 }
0x1014   :  { %v1991_v14 = vpop.xlane.xlu1 %1990 }
0x1015   :  { %v1993_v15 = vmul.f32 0.03125, %v1991_v14  ;;  %v1988_v16 = vpop.xlane.xlu0 %1987 }
0x1016   :  { %v1992_v17 = vmul.f32 0.03125, %v1988_v16  ;;  %v4579_v16 = vld [vmem:[%s6164_s5 + $0x28] sm:$0xff] }
0x1017   :  { %v1995_v18 = vadd.f32 1e-12, %v1993_v15  ;;  %v4578_v15 = vld [vmem:[%s6164_s5 + $0x20] sm:$0xff] }
0x1018   :  { %v1994_v19 = vadd.f32 1e-12, %v1992_v17  ;;  %v5217_v17 = vpack.c.bf16 %v4579_v16, %v4578_v15 }
0x1019   :  { %5333 = vrsqrt.f32 %v1995_v18  ;;  %v4580_v18 = vld [vmem:[%s6164_s5 + $0x30] sm:$0xff] }
0x101a   :  { %5335 = vrsqrt.f32 %v1994_v19  ;;  %v4581_v19 = vld [vmem:[%s6164_s5 + $0x38] sm:$0xff]  ;;  %5218 = vmatprep.subr.bf16.mxu1 %v5217_v17 }
0x1023   :  { %v5334_v20 = vpop.eup %5333 }
0x1024   :  { %v5336_v22 = vpop.eup %5335  ;;  %v1999_v23 = vmul.f32 %v5334_v20, %v1983_v1  ;;  %v5221_v20 = vpack.c.bf16 %v4581_v19, %v4580_v18 }
0x1025   :  { %v1998_v24 = vmul.f32 %v5336_v22, %v1982_v2 }
0x1026   :  { %v2005_v26 = vmul.f32 %v4568_v21, %v1999_v23 }
0x1027   :  { %v2004_v28 = vmul.f32 %v4568_v21, %v1998_v24 }
0x1028   :  { %v2011_v31 = vadd.f32 %v4569_v25, %v2005_v26 }
0x1029   :  { %v2010_v29 = vadd.f32 %v4569_v25, %v2004_v28 }
0x102b   :  { %4968 = vmatprep.mubr.msk.f32.mxu1 %vm146_vm2, %v2010_v29 }
0x102c   :  { %4969 = vmatmul.mubr.msk.f32.vlgmr.msra.gmra.mrb[26].mxu1 %vm146_vm2, %v2011_v31 }
0x102d   :  { %5220 = vmatpush3.bf16.msra.mxu1 %v5217_v17 }
0x102e   :  { %5222 = vmatprep.subr.bf16.mxu1 %v5221_v20 }
0x1031   :  { %5224 = vmatpush3.bf16.msra.mxu1 %v5221_v20 }
0x1032   :  { %5001 = vmatprep.subr.mxu1 %v5423_v7 }
0x10ff   :  { %v4970_v44 = vpop.f32.mrb[26].mxu1 }
0x1100   :  { %v2099_v45 = vadd.f32 %v4970_v44, %v4570_v43  ;;  %v2093_v46 = vpop.f32.mrb[27].mxu1 }
0x1101   :  { %v2094_v47 = vadd.f32 %v4570_v43, %v2093_v46 }
0x1102   :  { %v2105_v48 = vmul.f32 0.70710677, %v2099_v45  ;;  %v2103_v54 = vmul.f32 0.5, %v2099_v45 }
0x1103   :  { %v2104_v49 = vmul.f32 0.70710677, %v2094_v47  ;;  %v2102_v52 = vmul.f32 0.5, %v2094_v47 }
0x1104   :  { %5337 = verf.f32 %v2105_v48 }
0x1105   :  { %5339 = verf.f32 %v2104_v49 }
0x110e   :  { %v5338_v12 = vpop.eup %5337 }
0x110f   :  { %v5340_v50 = vpop.eup %5339  ;;  %v2109_v51 = vadd.f32 1.0, %v5338_v12 }
0x1110   :  { %v2108_v53 = vadd.f32 1.0, %v5340_v50 }
0x1111   :  { %v2111_v56 = vmul.f32 %v2109_v51, %v2103_v54 }
0x1112   :  { %v2110_v55 = vmul.f32 %v2108_v53, %v2102_v52 }
0x1114   :  { %4987 = vmatprep.mubr.msk.f32.mxu0 %vm2125_vm5, %v2110_v55 }
0x1115   :  { %4988 = vmatmul.mubr.msk.f32.vlgmr.msra.gmra.mrb[12].mxu0 %vm2125_vm5, %v2111_v56 }
0x1116   :  { %5013 = vmatprep.mubr.msk.f32.mxu0 %vm5424_vm3, %v5423_v7 }
0x11e8   :  { %v4989_v58 = vpop.f32.mrb[12].mxu0 }
0x11e9   :  { %v2204_v59 = vadd.f32 %v4989_v58, %v4573_v57  ;;  %v2198_v61 = vpop.f32.mrb[13].mxu0 }
0x11ea   :  { %v2199_v63 = vadd.f32 %v4573_v57, %v2198_v61 }
0x11eb   :  { %v2208_v0 = vadd.f32 %v2204_v59, %v2011_v31 }
0x11ec   :  { %v2207_v1 = vadd.f32 %v2199_v63, %v2010_v29  ;;  %v4576_v29 = vld [vmem:[%s6161_s2 + $0x14] ss:$0 sm:$0xff] }
0x11ed   :  { %v2214_v2 = vsel %vm146_vm2, %v2208_v0, 0.0 }
0x11ee   :  { %2215 = vadd.xlane.f32.xlu1 %v2214_v2  ;;  %v2211_v60 = vsel %vm146_vm2, %v2207_v1, 0.0 }
0x11ef   :  { %2212 = vadd.xlane.f32.xlu0 %v2211_v60 }
0x127b   :  { %v2216_v3 = vpop.xlane.xlu1 %2215 }
0x127c   :  { %v2218_v5 = vmul.f32 0.03125, %v2216_v3  ;;  %v2213_v6 = vpop.xlane.xlu0 %2212 }
0x127d   :  { %v2217_v4 = vmul.f32 0.03125, %v2213_v6 }
0x127e   :  { %v2220_v8 = vsub.f32 %v2208_v0, %v2218_v5 }
0x127f   :  { %v2219_v9 = vsub.f32 %v2207_v1, %v2217_v4 }
0x1280   :  { %v2222_v62 = vmul.f32 %v2220_v8, %v2220_v8 }
0x1281   :  { %v2221_v10 = vmul.f32 %v2219_v9, %v2219_v9 }
0x1282   :  { %v2226_v13 = vsel %vm146_vm2, %v2222_v62, 0.0 }
0x1283   :  { %2227 = vadd.xlane.f32.xlu1 %v2226_v13  ;;  %v2223_v14 = vsel %vm146_vm2, %v2221_v10, 0.0 }
0x1284   :  { %2224 = vadd.xlane.f32.xlu0 %v2223_v14 }
0x1310   :  { %v2228_v21 = vpop.xlane.xlu1 %2227 }
0x1311   :  { %v2230_v22 = vmul.f32 0.03125, %v2228_v21  ;;  %v2225_v23 = vpop.xlane.xlu0 %2224 }
0x1312   :  { %v2229_v24 = vmul.f32 0.03125, %v2225_v23 }
0x1313   :  { %v2232_v25 = vadd.f32 1e-12, %v2230_v22 }
0x1314   :  { %v2231_v26 = vadd.f32 1e-12, %v2229_v24 }
0x1315   :  { %5341 = vrsqrt.f32 %v2232_v25 }
0x1316   :  { %5343 = vrsqrt.f32 %v2231_v26 }
0x131f   :  { %v5342_v28 = vpop.eup %5341 }
0x1320   :  { %v5344_v31 = vpop.eup %5343  ;;  %v2236_v33 = vmul.f32 %v5342_v28, %v2220_v8 }
0x1321   :  { %v2235_v34 = vmul.f32 %v5344_v31, %v2219_v9 }
0x1322   :  { %v2242_v36 = vmul.f32 %v4576_v29, %v2236_v33 }
0x1323   :  { %v2241_v27 = vmul.f32 %v4576_v29, %v2235_v34 }
0x1324   :  { %v5855_v38 = vadd.f32 %v4577_v35, %v2242_v36 }
0x1325   :  { %v5853_v37 = vadd.f32 %v4577_v35, %v2241_v27 }
0x1327   :  { %4998 = vmatprep.mubr.msk.f32.mxu1 %vm146_vm2, %v5853_v37 }
0x1328   :  { %4999 = vmatmul.mubr.msk.f32.vlgmr.msra.gmra.mrb[28].mxu1 %vm146_vm2, %v5855_v38 }
0x1329   :  { %5003 = vmatprep.mubr.msk.f32.mxu1 %vm5424_vm3, %v5423_v7 }
0x13fb   :  { %v5000_v40 = vpop.f32.mrb[28].mxu1 }
0x13fc   :  { %v5866_v41 = vadd.f32 %v5000_v40, %v4582_v39  ;;  %v2331_v42 = vpop.f32.mrb[29].mxu1 }
0x13fd   :  { %v5868_v11 = vadd.f32 %v4582_v39, %v2331_v42 }
0x13fe   :  { %2423 = vrot.lane.b32.xlu1 %v5866_v41, %s5426_s23 }
0x13ff   :  { %2346 = vrot.lane.b32.xlu0 %v5868_v11, %s5426_s23 }
0x1470   :  { %v2424_v44 = vpop.permute.xlu1 %2423 }
0x1471   :  { %v2347_v43 = vpop.permute.xlu0 %2346 }
0x1472   :  { %5002 = vmatpush3.xpose.msk.msra.mxu1 %vm319_vm4, %v2347_v43 }
0x1473   :  { %5006 = vmatprep.subr.mxu1 %v5423_v7 }
0x1475   :  { %5004 = vmatmul.mubr.msk.f32.vlgmr.msra.gmra.mrb[30].mxu1 %vm319_vm4, %v5868_v11 }
0x1476   :  { %5007 = vmatpush3.xpose.msk.msra.mxu1 %vm319_vm4, %v2424_v44  ;;  %5008 = vmatprep.mubr.msk.f32.mxu1 %vm5424_vm3, %v5423_v7 }
0x1477   :  { %5016 = vmatprep.subr.mxu1 %v5423_v7 }
0x1479   :  { %5009 = vmatmul.mubr.msk.f32.vlgmr.msra.gmra.mrb[32].mxu1 %vm319_vm4, %v5866_v41 }
0x147a   :  { %5018 = vmatprep.mubr.msk.f32.mxu1 %vm5424_vm3, %v5423_v7 }
0x1548   :  { %v2418_v45 = vpop.f32.mrb[30].mxu1 }
0x1549   :  { %v5005_v46 = vpop.f32.mrb[31].mxu1  ;;  %v2419_v55 = vadd.f32 %v2418_v45, %v5619_v30 }
0x154b   :  { %v2499_v56 = vsel %vm319_vm4, %v2419_v55, -inf }
0x154c   :  { %v2495_v47 = vpop.f32.mrb[32].mxu1 }
0x154d   :  { %v2496_v48 = vadd.f32 %v2495_v47, %v5621_v32  ;;  %v5010_v49 = vpop.f32.mrb[33].mxu1 }
0x154f   :  { %v2502_v12 = vsel %vm319_vm4, %v2496_v48, -inf }
0x1550   :  { %2503 = vmax.xlane.f32.xlu1 %v2502_v12 }
0x1561   :  { %2753 = vrot.lane.b32.xlu1 %v5866_v41, %s5428_s1 }
0x1565   :  { %2751 = vrot.lane.b32.xlu1 %v5866_v41, %s5429_s26 }
0x15dd   :  { %v2504_v50 = vpop.xlane.xlu1 %2503 }
0x15de   :  { %v2506_v51 = vsub.f32 %v2496_v48, %v2504_v50 }
0x15e0   :  { %v2509_v52 = vmul.f32 1.442695, %v2506_v51 }
0x15e1   :  { %v2754_v61 = vpop.permute.xlu1 %2753 }
0x15e2   :  { %5345 = vpow2.f32 %v2509_v52 }
0x15e5   :  { %v2752_v0 = vpop.permute.xlu1 %2751 }
0x15ec   :  { %v5346_v53 = vpop.eup %5345 }
0x15ed   :  { %v2514_v54 = vsel %vm319_vm4, %v5346_v53, 0.0 }
0x15ee   :  { %2515 = vadd.xlane.f32.xlu0 %v2514_v54 }
0x1604   :  { %2597 = vrot.lane.b32.xlu0 %v5866_v41, %s5425_s22 }
0x1623   :  { %2500 = vmax.xlane.f32.xlu0 %v2499_v56 }
0x1639   :  { %2521 = vrot.lane.b32.xlu0 %v5868_v11, %s5425_s22 }
0x163d   :  { %2673 = vrot.lane.b32.xlu0 %v5868_v11, %s5429_s26 }
0x167b   :  { %v2516_v57 = vpop.xlane.xlu0 %2515 }
0x167c   :  { %5347 = vrcp.f32 %v2516_v57 }
0x167f   :  { %v2598_v58 = vpop.permute.xlu0 %2597 }
0x1680   :  { %5017 = vmatpush3.msra.mxu1 %v2598_v58 }
0x1681   :  { %5026 = vmatprep.subr.mxu1 %v5423_v7 }
0x1686   :  { %v5348_v59 = vpop.eup %5347 }
0x1687   :  { %v2520_v63 = vmul.f32 %v5348_v59, %v5346_v53 }
0x1689   :  { %5019 = vmatmul.mubr.msk.f32.vlgmr.msra.gmra.mrb[34].mxu1 %vm319_vm4, %v2520_v63  ;;  %v4586_v63 = vld [vmem:[%s6165_s6 + $0x28] sm:$0xff] }
0x168a   :  { %5027 = vmatpush3.xpose.msk.msra.mxu1 %vm319_vm4, %v2754_v61  ;;  %5028 = vmatprep.mubr.msk.f32.mxu1 %vm5424_vm3, %v5423_v7 }
0x168b   :  { %5036 = vmatprep.subr.mxu1 %v5423_v7 }
0x168d   :  { %5029 = vmatmul.mubr.msk.f32.vlgmr.msra.gmra.mrb[36].mxu1 %vm319_vm4, %v2752_v0  ;;  %v4585_v0 = vld [vmem:[%s6165_s6 + $0x20] sm:$0xff] }
0x168e   :  { %5038 = vmatprep.mubr.msk.f32.mxu1 %vm5424_vm3, %v5423_v7 }
0x16b0   :  { %v2501_v1 = vpop.xlane.xlu0 %2500 }
0x16b1   :  { %v2505_v2 = vsub.f32 %v2419_v55, %v2501_v1 }
0x16b3   :  { %v2507_v60 = vmul.f32 1.442695, %v2505_v2 }
0x16b4   :  { %v2522_v3 = vpop.permute.xlu0 %2521 }
0x16b5   :  { %5349 = vpow2.f32 %v2507_v60  ;;  %5012 = vmatpush3.msra.mxu0 %v2522_v3 }
0x16b6   :  { %5021 = vmatprep.subr.mxu0 %v5423_v7 }
0x16b8   :  { %v2674_v14 = vpop.permute.xlu0 %2673 }
0x16bf   :  { %v5350_v5 = vpop.eup %5349 }
0x16c0   :  { %v2511_v6 = vsel %vm319_vm4, %v5350_v5, 0.0 }
0x16c1   :  { %2512 = vadd.xlane.f32.xlu1 %v2511_v6 }
0x16d2   :  { %2675 = vrot.lane.b32.xlu1 %v5868_v11, %s5428_s1 }
0x174e   :  { %v2513_v4 = vpop.xlane.xlu1 %2512 }
0x174f   :  { %5351 = vrcp.f32 %v2513_v4 }
0x1752   :  { %v2676_v62 = vpop.permute.xlu1 %2675 }
0x1759   :  { %v5352_v8 = vpop.eup %5351 }
0x175a   :  { %v2519_v9 = vmul.f32 %v5352_v8, %v5350_v5 }
0x175c   :  { %5014 = vmatmul.mubr.msk.f32.vlgmr.msra.gmra.mrb[14].mxu0 %vm319_vm4, %v2519_v9  ;;  %v5915_v10 = vpop.f32.mrb[34].mxu1 }
0x175d   :  { %5022 = vmatpush3.xpose.msk.msra.mxu0 %vm319_vm4, %v2676_v62  ;;  %v5020_v13 = vpop.f32.mrb[35].mxu1  ;;  %5023 = vmatprep.mubr.msk.f32.mxu0 %vm5424_vm3, %v5423_v7 }
0x175e   :  { %5031 = vmatprep.subr.mxu0 %v5423_v7 }
0x1760   :  { %5024 = vmatmul.mubr.msk.f32.vlgmr.msra.gmra.mrb[16].mxu0 %vm319_vm4, %v2674_v14  ;;  %v2825_v15 = vpop.f32.mrb[36].mxu1 }
0x1761   :  { %v2826_v16 = vadd.f32 %v2825_v15, %v5621_v32  ;;  %v5030_v17 = vpop.f32.mrb[37].mxu1  ;;  %5033 = vmatprep.mubr.msk.f32.mxu0 %vm5424_vm3, %v5423_v7  ;;  %v4587_v15 = vld [vmem:[%s6165_s6 + $0x30] sm:$0xff] }
0x1763   :  { %v2832_v18 = vsel %vm319_vm4, %v2826_v16, -inf }
0x1764   :  { %2833 = vmax.xlane.f32.xlu1 %v2832_v18 }
0x1775   :  { %3167 = vrot.lane.b32.xlu1 %v5868_v11, %s5430_s27 }
0x1779   :  { %3165 = vrot.lane.b32.xlu1 %v5868_v11, %s5431_s28 }
0x177d   :  { %3243 = vrot.lane.b32.xlu1 %v5866_v41, %s5431_s28 }
0x17f1   :  { %v2834_v19 = vpop.xlane.xlu1 %2833 }
0x17f2   :  { %v2836_v20 = vsub.f32 %v2826_v16, %v2834_v19 }
0x17f4   :  { %v2839_v21 = vmul.f32 1.442695, %v2836_v20 }
0x17f5   :  { %v3168_v35 = vpop.permute.xlu1 %3167 }
0x17f6   :  { %5353 = vpow2.f32 %v2839_v21 }
0x17f9   :  { %v3166_v39 = vpop.permute.xlu1 %3165 }
0x17fd   :  { %v3244_v42 = vpop.permute.xlu1 %3243 }
0x1800   :  { %v5354_v22 = vpop.eup %5353 }
0x1801   :  { %v2844_v23 = vsel %vm319_vm4, %v5354_v22, 0.0 }
0x1802   :  { %2845 = vadd.xlane.f32.xlu0 %v2844_v23 }
0x1818   :  { %2927 = vrot.lane.b32.xlu0 %v5866_v41, %s5432_s29 }
0x181c   :  { %3245 = vrot.lane.b32.xlu0 %v5866_v41, %s5430_s27 }
0x182f   :  { %v5937_v24 = vpop.f32.mrb[14].mxu0 }
0x1830   :  { %v5015_v25 = vpop.f32.mrb[15].mxu0 }
0x1833   :  { %v2747_v26 = vpop.f32.mrb[16].mxu0 }
0x1834   :  { %v5025_v28 = vpop.f32.mrb[17].mxu0  ;;  %v2748_v29 = vadd.f32 %v2747_v26, %v5619_v30 }
0x1836   :  { %v2829_v31 = vsel %vm319_vm4, %v2748_v29, -inf }
0x183b   :  { %2830 = vmax.xlane.f32.xlu0 %v2829_v31 }
0x1851   :  { %2851 = vrot.lane.b32.xlu0 %v5868_v11, %s5432_s29 }
0x1855   :  { %3343 = vrot.lane.b32.xlu0 %v5868_v11, %s5433_s3 }
0x1859   :  { %3580 = vrot.lane.b32.xlu0 %v5868_v11, %s5434_s30 }
0x185d   :  { %3658 = vrot.lane.b32.xlu0 %v5866_v41, %s5434_s30 }
0x1861   :  { %3578 = vrot.lane.b32.xlu0 %v5868_v11, %s5435_s11 }
0x1865   :  { %3656 = vrot.lane.b32.xlu0 %v5866_v41, %s5435_s11 }
0x188f   :  { %v2846_v33 = vpop.xlane.xlu0 %2845 }
0x1890   :  { %5355 = vrcp.f32 %v2846_v33 }
0x1893   :  { %v2928_v34 = vpop.permute.xlu0 %2927 }
0x1894   :  { %5037 = vmatpush3.msra.mxu1 %v2928_v34 }
0x1895   :  { %5051 = vmatprep.subr.mxu1 %v5423_v7 }
0x1897   :  { %v3246_v40 = vpop.permute.xlu0 %3245 }
0x189a   :  { %v5356_v36 = vpop.eup %5355 }
0x189b   :  { %v2850_v27 = vmul.f32 %v5356_v36, %v5354_v22 }
0x189d   :  { %5039 = vmatmul.mubr.msk.f32.vlgmr.msra.gmra.mrb[38].mxu1 %vm319_vm4, %v2850_v27 }
0x189e   :  { %5052 = vmatpush3.xpose.msk.msra.mxu1 %vm319_vm4, %v3168_v35  ;;  %5053 = vmatprep.mubr.msk.f32.mxu1 %vm5424_vm3, %v5423_v7 }
0x189f   :  { %5056 = vmatprep.subr.mxu1 %v5423_v7 }
0x18a1   :  { %5054 = vmatmul.mubr.msk.f32.vlgmr.msra.gmra.mrb[40].mxu1 %vm319_vm4, %v3166_v39 }
0x18a2   :  { %5057 = vmatpush3.xpose.msk.msra.mxu1 %vm319_vm4, %v3246_v40  ;;  %5058 = vmatprep.mubr.msk.f32.mxu1 %vm5424_vm3, %v5423_v7 }
0x18a3   :  { %5066 = vmatprep.subr.mxu1 %v5423_v7 }
0x18a5   :  { %5059 = vmatmul.mubr.msk.f32.vlgmr.msra.gmra.mrb[42].mxu1 %vm319_vm4, %v3244_v42 }
0x18a6   :  { %5068 = vmatprep.mubr.msk.f32.mxu1 %vm5424_vm3, %v5423_v7 }
0x18c8   :  { %v2831_v43 = vpop.xlane.xlu0 %2830 }
0x18c9   :  { %v2835_v44 = vsub.f32 %v2748_v29, %v2831_v43 }
0x18cb   :  { %v2837_v45 = vmul.f32 1.442695, %v2835_v44 }
0x18cc   :  { %v2852_v46 = vpop.permute.xlu0 %2851 }
0x18cd   :  { %5357 = vpow2.f32 %v2837_v45  ;;  %5032 = vmatpush3.msra.mxu0 %v2852_v46 }
0x18ce   :  { %5041 = vmatprep.subr.mxu0 %v4586_v63 }
0x18d0   :  { %v3344_v16 = vpop.permute.xlu0 %3343 }
0x18d4   :  { %v3581_v20 = vpop.permute.xlu0 %3580 }
0x18d7   :  { %v5358_v47 = vpop.eup %5357 }
0x18d8   :  { %v2841_v48 = vsel %vm319_vm4, %v5358_v47, 0.0 }
0x18d9   :  { %2842 = vadd.xlane.f32.xlu1 %v2841_v48 }
0x1966   :  { %v2843_v49 = vpop.xlane.xlu1 %2842 }
0x1967   :  { %5359 = vrcp.f32 %v2843_v49 }
0x1970   :  { %v2999_v12 = vpop.f32.mrb[38].mxu1 }
0x1971   :  { %v5360_v50 = vpop.eup %5359  ;;  %v5040_v51 = vpop.f32.mrb[39].mxu1 }
0x1972   :  { %v2849_v52 = vmul.f32 %v5360_v50, %v5358_v47 }
0x1974   :  { %5034 = vmatmul.mubr.msk.f32.vlgmr.msra.gmra.mrb[18].mxu0 %vm319_vm4, %v2849_v52  ;;  %v3239_v53 = vpop.f32.mrb[40].mxu1 }
0x1975   :  { %v3240_v54 = vadd.f32 %v3239_v53, %v5619_v30  ;;  %v5055_v55 = vpop.f32.mrb[41].mxu1  ;;  %5042 = vmatpush3.msra.mxu0 %v4586_v63  ;;  %v4621_v63 = vld [vmem:[%s6161_s2 + $0x17] ss:$0 sm:$0xff] }
0x1976   :  { %5046 = vmatprep.subr.mxu0 %v4585_v0 }
0x1977   :  { %v3321_v56 = vsel %vm319_vm4, %v3240_v54, -inf }
0x1978   :  { %3322 = vmax.xlane.f32.xlu1 %v3321_v56  ;;  %v3317_v57 = vpop.f32.mrb[42].mxu1 }
0x1979   :  { %v3318_v58 = vadd.f32 %v3317_v57, %v5621_v32  ;;  %v5060_v59 = vpop.f32.mrb[43].mxu1 }
0x197b   :  { %v3324_v61 = vsel %vm319_vm4, %v3318_v58, -inf }
0x197c   :  { %3325 = vmax.xlane.f32.xlu1 %v3324_v61 }
0x1a05   :  { %v3323_v1 = vpop.xlane.xlu1 %3322 }
0x1a06   :  { %v3327_v2 = vsub.f32 %v3240_v54, %v3323_v1  ;;  %v4588_v54 = vld [vmem:[%s6165_s6 + $0x38] sm:$0xff] }
0x1a08   :  { %v3329_v60 = vmul.f32 1.442695, %v3327_v2 }
0x1a09   :  { %v3326_v3 = vpop.xlane.xlu1 %3325 }
0x1a0a   :  { %5361 = vpow2.f32 %v3329_v60  ;;  %v3328_v5 = vsub.f32 %v3318_v58, %v3326_v3 }
0x1a0c   :  { %v3331_v6 = vmul.f32 1.442695, %v3328_v5 }
0x1a0e   :  { %5363 = vpow2.f32 %v3331_v6 }
0x1a14   :  { %v5362_v4 = vpop.eup %5361 }
0x1a15   :  { %v3333_v8 = vsel %vm319_vm4, %v5362_v4, 0.0 }
0x1a16   :  { %3334 = vadd.xlane.f32.xlu1 %v3333_v8 }
0x1a18   :  { %v5364_v9 = vpop.eup %5363 }
0x1a19   :  { %v3336_v62 = vsel %vm319_vm4, %v5364_v9, 0.0 }
0x1a1a   :  { %3337 = vadd.xlane.f32.xlu1 %v3336_v62 }
0x1a2b   :  { %3419 = vrot.lane.b32.xlu1 %v5866_v41, %s5433_s3 }
0x1a47   :  { %v2923_v13 = vpop.f32.mrb[18].mxu0 }
0x1a48   :  { %v5035_v14 = vpop.f32.mrb[19].mxu0  ;;  %5043 = vmatprep.mubr.msk.f32.mxu0 %vm319_vm4, %v2923_v13 }
0x1a49   :  { %5044 = vmatmul.mubr.msk.f32.vlgmr.msra.gmra.mrb[20].mxu0 %vm319_vm4, %v2999_v12 }
0x1a4a   :  { %5048 = vmatprep.mubr.msk.f32.mxu0 %vm319_vm4, %v5937_v24  ;;  %5047 = vmatpush3.msra.mxu0 %v4585_v0 }
0x1a4b   :  { %5061 = vmatprep.subr.mxu0 %v5423_v7 }
0x1a51   :  { %5049 = vmatmul.mubr.msk.f32.vlgmr.msra.gmra.mrb[20].mxu0 %vm319_vm4, %v5915_v10  ;;  %v3659_v10 = vpop.permute.xlu0 %3658 }
0x1a52   :  { %5062 = vmatpush3.msra.mxu0 %v3344_v16  ;;  %5063 = vmatprep.mubr.msk.f32.mxu0 %vm5424_vm3, %v5423_v7 }
0x1a53   :  { %5071 = vmatprep.subr.mxu0 %v4587_v15 }
0x1a55   :  { %v3579_v25 = vpop.permute.xlu0 %3578 }
0x1a59   :  { %v3657_v33 = vpop.permute.xlu0 %3656 }
0x1aa3   :  { %v3335_v17 = vpop.xlane.xlu1 %3334 }
0x1aa4   :  { %5365 = vrcp.f32 %v3335_v17 }
0x1aa7   :  { %v3338_v18 = vpop.xlane.xlu1 %3337 }
0x1aa8   :  { %5367 = vrcp.f32 %v3338_v18 }
0x1aab   :  { %v3420_v19 = vpop.permute.xlu1 %3419 }
0x1aac   :  { %5067 = vmatpush3.msra.mxu1 %v3420_v19  ;;  %v4625_v19 = vld [vmem:[%s6166_s7 + $0x28] sm:$0xff] }
0x1aad   :  { %5076 = vmatprep.subr.mxu1 %v5423_v7 }
0x1aae   :  { %v5366_v21 = vpop.eup %5365 }
0x1aaf   :  { %v3341_v22 = vmul.f32 %v5366_v21, %v5362_v4  ;;  %v4626_v21 = vld [vmem:[%s6166_s7 + $0x30] sm:$0xff] }
0x1ab1   :  { %5064 = vmatmul.mubr.msk.f32.vlgmr.msra.gmra.mrb[22].mxu0 %vm319_vm4, %v3341_v22  ;;  %v4627_v22 = vld [vmem:[%s6166_s7 + $0x38] sm:$0xff] }
0x1ab2   :  { %v5368_v23 = vpop.eup %5367  ;;  %5072 = vmatpush3.msra.mxu0 %v4587_v15 }
0x1ab3   :  { %v3342_v24 = vmul.f32 %v5368_v23, %v5364_v9  ;;  %5081 = vmatprep.subr.mxu0 %v5423_v7  ;;  %v5229_v23 = vpack.c.bf16 %v4627_v22, %v4626_v21  ;;  %v4278_v22 = vld [vmem:[%s6168_s9] sm:$0xff] }
0x1ab5   :  { %5069 = vmatmul.mubr.msk.f32.vlgmr.msra.gmra.mrb[44].mxu1 %vm319_vm4, %v3342_v24 }
0x1ab6   :  { %5077 = vmatpush3.xpose.msk.msra.mxu1 %vm319_vm4, %v3581_v20  ;;  %5078 = vmatprep.mubr.msk.f32.mxu1 %vm5424_vm3, %v5423_v7 }
0x1ab7   :  { %5086 = vmatprep.subr.mxu1 %v5423_v7 }
0x1ab9   :  { %5079 = vmatmul.mubr.msk.f32.vlgmr.msra.gmra.mrb[46].mxu1 %vm319_vm4, %v3579_v25 }
0x1aba   :  { %5088 = vmatprep.mubr.msk.f32.mxu1 %vm5424_vm3, %v5423_v7 }
0x1b84   :  { %v3415_v26 = vpop.f32.mrb[22].mxu0 }
0x1b85   :  { %v5065_v28 = vpop.f32.mrb[23].mxu0  ;;  %5073 = vmatprep.mubr.msk.f32.mxu0 %vm319_vm4, %v3415_v26 }
0x1b88   :  { %v3491_v29 = vpop.f32.mrb[44].mxu1 }
0x1b89   :  { %v5070_v31 = vpop.f32.mrb[45].mxu1  ;;  %5074 = vmatmul.mubr.msk.f32.vlgmr.msra.gmra.mrb[20].mxu0 %vm319_vm4, %v3491_v29 }
0x1b8a   :  { %5082 = vmatpush3.xpose.msk.msra.mxu0 %vm319_vm4, %v3659_v10  ;;  %5083 = vmatprep.mubr.msk.f32.mxu0 %vm5424_vm3, %v5423_v7 }
0x1b8b   :  { %5091 = vmatprep.subr.mxu0 %v5423_v7 }
0x1b8c   :  { %v3652_v34 = vpop.f32.mrb[46].mxu1 }
0x1b8d   :  { %v3653_v35 = vadd.f32 %v3652_v34, %v5619_v30  ;;  %v5080_v36 = vpop.f32.mrb[47].mxu1  ;;  %5084 = vmatmul.mubr.msk.f32.vlgmr.msra.gmra.mrb[24].mxu0 %vm319_vm4, %v3657_v33  ;;  %v4622_v33 = vld [vmem:[%s6161_s2 + $0x18] ss:$0 sm:$0xff] }
0x1b8e   :  { %5093 = vmatprep.mubr.msk.f32.mxu0 %vm5424_vm3, %v5423_v7 }
0x1b8f   :  { %v3734_v27 = vsel %vm319_vm4, %v3653_v35, -inf }
0x1b90   :  { %3735 = vmax.xlane.f32.xlu1 %v3734_v27  ;;  %v4623_v27 = vld [vmem:[%s6161_s2 + $0x19] ss:$0 sm:$0xff] }
0x1c1d   :  { %v3736_v39 = vpop.xlane.xlu1 %3735 }
0x1c1e   :  { %v3740_v40 = vsub.f32 %v3653_v35, %v3736_v39 }
0x1c20   :  { %v3742_v42 = vmul.f32 1.442695, %v3740_v40 }
0x1c22   :  { %5369 = vpow2.f32 %v3742_v42 }
0x1c2c   :  { %v5370_v30 = vpop.eup %5369 }
0x1c2d   :  { %v3746_v47 = vsel %vm319_vm4, %v5370_v30, 0.0 }
0x1c60   :  { %v3730_v43 = vpop.f32.mrb[24].mxu0 }
0x1c61   :  { %v3731_v44 = vadd.f32 %v3730_v43, %v5621_v32  ;;  %v5085_v45 = vpop.f32.mrb[25].mxu0 }
0x1c62   :  { %v4632_v45 = vld [vmem:[%s6167_s8 + $0x48] sm:$0xff] }
0x1c63   :  { %v3737_v46 = vsel %vm319_vm4, %v3731_v44, -inf }
0x1c64   :  { %3738 = vmax.xlane.f32.xlu0 %v3737_v46 }
0x1c68   :  { %3747 = vadd.xlane.f32.xlu0 %v3746_v47  ;;  %v4634_v47 = vld [vmem:[%s6167_s8 + $0x58] sm:$0xff] }
0x1c7e   :  { %3756 = vrot.lane.b32.xlu0 %v5868_v11, %s5436_s17 }
0x1cf1   :  { %v3739_v7 = vpop.xlane.xlu0 %3738 }
0x1cf2   :  { %v3741_v48 = vsub.f32 %v3731_v44, %v3739_v7  ;;  %v4631_v44 = vld [vmem:[%s6167_s8 + $0x40] sm:$0xff] }
0x1cf3   :  { %v5233_v46 = vpack.c.bf16 %v4632_v45, %v4631_v44 }
0x1cf4   :  { %v3744_v49 = vmul.f32 1.442695, %v3741_v48  ;;  %v4635_v48 = vld [vmem:[%s6167_s8 + $0x60] sm:$0xff] }
0x1cf5   :  { %v3748_v12 = vpop.xlane.xlu0 %3747 }
0x1cf6   :  { %5371 = vpow2.f32 %v3744_v49  ;;  %v4636_v49 = vld [vmem:[%s6167_s8 + $0x68] sm:$0xff] }
0x1cf7   :  { %5373 = vrcp.f32 %v3748_v12  ;;  %v5241_v12 = vpack.c.bf16 %v4636_v49, %v4635_v48 }
0x1cf9   :  { %v3757_v50 = vpop.permute.xlu0 %3756 }
0x1cfa   :  { %5087 = vmatpush3.msra.mxu1 %v3757_v50  ;;  %v4637_v50 = vld [vmem:[%s6167_s8 + $0x70] sm:$0xff] }
0x1d00   :  { %v5372_v32 = vpop.eup %5371 }
0x1d01   :  { %v5374_v51 = vpop.eup %5373  ;;  %v3749_v52 = vsel %vm319_vm4, %v5372_v32, 0.0 }
0x1d02   :  { %v3754_v53 = vmul.f32 %v5374_v51, %v5370_v30  ;;  %3750 = vadd.xlane.f32.xlu1 %v3749_v52  ;;  %v4633_v30 = vld [vmem:[%s6167_s8 + $0x50] sm:$0xff]  ;;  %v4628_v52 = vld [vmem:[%s6161_s2 + $0x1a] ss:$0 sm:$0xff] }
0x1d03   :  { %v5237_v7 = vpack.c.bf16 %v4634_v47, %v4633_v30  ;;  %v4644_v47 = vld [vmem:[%s6161_s2 + $0x2] ss:$0 sm:$0xff] }
0x1d04   :  { %5089 = vmatmul.mubr.msk.f32.vlgmr.msra.gmra.mrb[48].mxu1 %vm319_vm4, %v3754_v53 }
0x1d13   :  { %3832 = vrot.lane.b32.xlu1 %v5866_v41, %s5436_s17 }
0x1d8f   :  { %v3751_v11 = vpop.xlane.xlu1 %3750 }
0x1d90   :  { %5375 = vrcp.f32 %v3751_v11 }
0x1d93   :  { %v3833_v55 = vpop.permute.xlu1 %3832 }
0x1d94   :  { %5092 = vmatpush3.msra.mxu0 %v3833_v55 }
0x1d95   :  { %5096 = vmatprep.subr.mxu0 %v4588_v54 }
0x1d9a   :  { %v5376_v56 = vpop.eup %5375 }
0x1d9b   :  { %v3755_v57 = vmul.f32 %v5376_v56, %v5372_v32  ;;  %v4638_v32 = vld [vmem:[%s6167_s8 + $0x78] sm:$0xff] }
0x1d9c   :  { %v5245_v51 = vpack.c.bf16 %v4638_v32, %v4637_v50 }
0x1d9d   :  { %5094 = vmatmul.mubr.msk.f32.vlgmr.msra.gmra.mrb[26].mxu0 %vm319_vm4, %v3755_v57 }
0x1d9e   :  { %5097 = vmatpush3.msra.mxu0 %v4588_v54 }
0x1d9f   :  { %5234 = vmatprep.subr.bf16.mxu0 %v5233_v46 }
0x1dd7   :  { %v3828_v58 = vpop.f32.mrb[48].mxu1 }
0x1dd8   :  { %v5090_v59 = vpop.f32.mrb[49].mxu1  ;;  %5098 = vmatprep.mubr.msk.f32.mxu0 %vm319_vm4, %v3828_v58 }
0x1e70   :  { %v3904_v61 = vpop.f32.mrb[26].mxu0 }
0x1e71   :  { %v5095_v41 = vpop.f32.mrb[27].mxu0  ;;  %5099 = vmatmul.mubr.msk.f32.vlgmr.msra.gmra.mrb[20].mxu0 %vm319_vm4, %v3904_v61 }
0x1e72   :  { %5236 = vmatpush3.bf16.msra.mxu0 %v5233_v46 }
0x1e73   :  { %5238 = vmatprep.subr.bf16.mxu0 %v5237_v7 }
0x1e76   :  { %5240 = vmatpush3.bf16.msra.mxu0 %v5237_v7 }
0x1e77   :  { %5242 = vmatprep.subr.bf16.mxu0 %v5241_v12 }
0x1e7a   :  { %5244 = vmatpush3.bf16.msra.mxu0 %v5241_v12 }
0x1e7b   :  { %5246 = vmatprep.subr.bf16.mxu0 %v5245_v51 }
0x1e7e   :  { %5248 = vmatpush3.bf16.msra.mxu0 %v5245_v51 }
0x1f44   :  { %v5100_v0 = vpop.f32.mrb[20].mxu0 }
0x1f45   :  { %v3997_v1 = vadd.f32 %v5100_v0, %v4621_v63  ;;  %v3980_v2 = vpop.f32.mrb[21].mxu0 }
0x1f46   :  { %v3996_v60 = vadd.f32 %v4621_v63, %v3980_v2 }
0x1f47   :  { %v3999_v3 = vadd.f32 %v3997_v1, %v5855_v38 }
0x1f48   :  { %v3998_v5 = vadd.f32 %v3996_v60, %v5853_v37  ;;  %v4624_v37 = vld [vmem:[%s6166_s7 + $0x20] sm:$0xff]  ;;  %v4639_v60 = vld [vmem:[%s6161_s2 + $0x1b] ss:$0 sm:$0xff] }
0x1f49   :  { %v4005_v6 = vsel %vm146_vm2, %v3999_v3, 0.0  ;;  %v5225_v20 = vpack.c.bf16 %v4625_v19, %v4624_v37 }
0x1f4a   :  { %4006 = vadd.xlane.f32.xlu0 %v4005_v6  ;;  %v4002_v4 = vsel %vm146_vm2, %v3998_v5, 0.0 }
0x1f4b   :  { %4003 = vadd.xlane.f32.xlu1 %v4002_v4  ;;  %5226 = vmatprep.subr.bf16.mxu1 %v5225_v20 }
0x1f4c   :  { %5228 = vmatpush3.bf16.msra.mxu1 %v5225_v20 }
0x1f4d   :  { %5230 = vmatprep.subr.bf16.mxu1 %v5229_v23 }
0x1f50   :  { %5232 = vmatpush3.bf16.msra.mxu1 %v5229_v23  ;;  %v4279_v23 = vld [vmem:[%s6168_s9 + $0x8] sm:$0xff] }
0x1fd7   :  { %v4007_v8 = vpop.xlane.xlu0 %4006 }
0x1fd8   :  { %v4009_v9 = vmul.f32 0.03125, %v4007_v8  ;;  %v4004_v62 = vpop.xlane.xlu1 %4003 }
0x1fd9   :  { %v4008_v13 = vmul.f32 0.03125, %v4004_v62 }
0x1fda   :  { %v4011_v14 = vsub.f32 %v3999_v3, %v4009_v9 }
0x1fdb   :  { %v4010_v15 = vsub.f32 %v3998_v5, %v4008_v13 }
0x1fdc   :  { %v4013_v16 = vmul.f32 %v4011_v14, %v4011_v14 }
0x1fdd   :  { %v4012_v17 = vmul.f32 %v4010_v15, %v4010_v15 }
0x1fde   :  { %v4017_v18 = vsel %vm146_vm2, %v4013_v16, 0.0 }
0x1fdf   :  { %4018 = vadd.xlane.f32.xlu1 %v4017_v18  ;;  %v4014_v38 = vsel %vm146_vm2, %v4012_v17, 0.0 }
0x1fe0   :  { %4015 = vadd.xlane.f32.xlu0 %v4014_v38 }
0x206c   :  { %v4019_v10 = vpop.xlane.xlu1 %4018 }
0x206d   :  { %v4021_v24 = vmul.f32 0.03125, %v4019_v10  ;;  %v4016_v25 = vpop.xlane.xlu0 %4015  ;;  %v5249_v10 = vpack.c.bf16 %v4279_v23, %v4278_v22 }
0x206e   :  { %v4020_v26 = vmul.f32 0.03125, %v4016_v25  ;;  %v4281_v25 = vld [vmem:[%s6168_s9 + $0x18] sm:$0xff] }
0x206f   :  { %v4023_v28 = vadd.f32 1e-12, %v4021_v24  ;;  %v4280_v24 = vld [vmem:[%s6168_s9 + $0x10] sm:$0xff]  ;;  %5250 = vmatprep.subr.bf16.mxu1 %v5249_v10 }
0x2070   :  { %v4022_v29 = vadd.f32 1e-12, %v4020_v26  ;;  %v5253_v26 = vpack.c.bf16 %v4281_v25, %v4280_v24 }
0x2071   :  { %5377 = vrsqrt.f32 %v4023_v28 }
0x2072   :  { %5379 = vrsqrt.f32 %v4022_v29 }
0x207b   :  { %v5378_v31 = vpop.eup %5377 }
0x207c   :  { %v5380_v34 = vpop.eup %5379  ;;  %v4027_v35 = vmul.f32 %v5378_v31, %v4011_v14 }
0x207d   :  { %v4026_v36 = vmul.f32 %v5380_v34, %v4010_v15 }
0x207e   :  { %v4033_v39 = vmul.f32 %v4622_v33, %v4027_v35 }
0x207f   :  { %v4032_v40 = vmul.f32 %v4622_v33, %v4026_v36 }
0x2080   :  { %v4039_v43 = vadd.f32 %v4623_v27, %v4033_v39 }
0x2081   :  { %v4038_v42 = vadd.f32 %v4623_v27, %v4032_v40  ;;  %v4642_v27 = vld [vmem:[%s6161_s2 + $0x1c] ss:$0 sm:$0xff] }
0x2083   :  { %5109 = vmatprep.mubr.msk.f32.mxu1 %vm146_vm2, %v4038_v42 }
0x2084   :  { %5110 = vmatmul.mubr.msk.f32.vlgmr.msra.gmra.mrb[50].mxu1 %vm146_vm2, %v4039_v43 }
0x2085   :  { %5252 = vmatpush3.bf16.msra.mxu1 %v5249_v10  ;;  %v4648_v10 = vld [vmem:[%s6161_s2 + $0x4] ss:$0 sm:$0xff] }
0x2086   :  { %5254 = vmatprep.subr.bf16.mxu1 %v5253_v26 }
0x2089   :  { %5256 = vmatpush3.bf16.msra.mxu1 %v5253_v26 }
0x2157   :  { %v5111_v53 = vpop.f32.mrb[50].mxu1 }
0x2158   :  { %v4128_v11 = vadd.f32 %v5111_v53, %v4628_v52  ;;  %v4122_v54 = vpop.f32.mrb[51].mxu1 }
0x2159   :  { %v4123_v55 = vadd.f32 %v4628_v52, %v4122_v54 }
0x215a   :  { %v4134_v56 = vmul.f32 0.70710677, %v4128_v11  ;;  %v4132_v0 = vmul.f32 0.5, %v4128_v11 }
0x215b   :  { %v4133_v57 = vmul.f32 0.70710677, %v4123_v55  ;;  %v4131_v41 = vmul.f32 0.5, %v4123_v55 }
0x215c   :  { %5381 = verf.f32 %v4134_v56 }
0x215d   :  { %5383 = verf.f32 %v4133_v57 }
0x2166   :  { %v5382_v58 = vpop.eup %5381 }
0x2167   :  { %v5384_v59 = vpop.eup %5383  ;;  %v4138_v61 = vadd.f32 1.0, %v5382_v58 }
0x2168   :  { %v4137_v63 = vadd.f32 1.0, %v5384_v59 }
0x2169   :  { %v4140_v2 = vmul.f32 %v4138_v61, %v4132_v0 }
0x216a   :  { %v4139_v1 = vmul.f32 %v4137_v63, %v4131_v41 }
0x216c   :  { %5128 = vmatprep.mubr.msk.f32.mxu0 %vm2125_vm5, %v4139_v1 }
0x216d   :  { %5129 = vmatmul.mubr.msk.f32.vlgmr.msra.gmra.mrb[28].mxu0 %vm2125_vm5, %v4140_v2 }
0x2240   :  { %v5130_v3 = vpop.f32.mrb[28].mxu0 }
0x2241   :  { %v4233_v5 = vadd.f32 %v5130_v3, %v4639_v60  ;;  %v4227_v6 = vpop.f32.mrb[29].mxu0 }
0x2242   :  { %v4228_v4 = vadd.f32 %v4639_v60, %v4227_v6 }
0x2243   :  { %v4237_v8 = vadd.f32 %v4233_v5, %v4039_v43  ;;  %v4643_v43 = vld [vmem:[%s6161_s2 + $0x1d] ss:$0 sm:$0xff] }
0x2244   :  { %v4236_v9 = vadd.f32 %v4228_v4, %v4038_v42  ;;  %v4418_v4 = vld [vmem:[%s6163_s4] sm:$0xff] }
0x2245   :  { %v4243_v62 = vsel %vm146_vm2, %v4237_v8, 0.0 }
0x2246   :  { %4244 = vadd.xlane.f32.xlu1 %v4243_v62  ;;  %v4240_v13 = vsel %vm146_vm2, %v4236_v9, 0.0  ;;  %v4420_v62 = vld [vmem:[%s6163_s4 + $0x10] sm:$0xff] }
0x2247   :  { %4241 = vadd.xlane.f32.xlu0 %v4240_v13  ;;  %v4421_v13 = vld [vmem:[%s6163_s4 + $0x18] sm:$0xff] }
0x22d3   :  { %v4245_v14 = vpop.xlane.xlu1 %4244 }
0x22d4   :  { %v4247_v15 = vmul.f32 0.03125, %v4245_v14  ;;  %v4242_v16 = vpop.xlane.xlu0 %4241  ;;  %v5261_v14 = vpack.c.bf16 %v4421_v13, %v4420_v62 }
0x22d5   :  { %v4246_v17 = vmul.f32 0.03125, %v4242_v16 }
0x22d6   :  { %v4249_v18 = vsub.f32 %v4237_v8, %v4247_v15  ;;  %v4419_v8 = vld [vmem:[%s6163_s4 + $0x8] sm:$0xff] }
0x22d7   :  { %v4248_v38 = vsub.f32 %v4236_v9, %v4246_v17  ;;  %v5257_v9 = vpack.c.bf16 %v4419_v8, %v4418_v4 }
0x22d8   :  { %v4251_v37 = vmul.f32 %v4249_v18, %v4249_v18 }
0x22d9   :  { %v4250_v19 = vmul.f32 %v4248_v38, %v4248_v38  ;;  %5258 = vmatprep.subr.bf16.mxu1 %v5257_v9 }
0x22da   :  { %v4255_v20 = vsel %vm146_vm2, %v4251_v37, 0.0 }
0x22db   :  { %4256 = vadd.xlane.f32.xlu1 %v4255_v20  ;;  %v4252_v21 = vsel %vm146_vm2, %v4250_v19, 0.0  ;;  %v4647_v20 = vld [vmem:[%s6161_s2 + $0x3] ss:$0 sm:$0xff] }
0x22dc   :  { %4253 = vadd.xlane.f32.xlu0 %v4252_v21 }
0x2368   :  { %v4257_v28 = vpop.xlane.xlu1 %4256 }
0x2369   :  { %v4259_v29 = vmul.f32 0.03125, %v4257_v28  ;;  %v4254_v31 = vpop.xlane.xlu0 %4253 }
0x236a   :  { %v4258_v33 = vmul.f32 0.03125, %v4254_v31 }
0x236b   :  { %v4261_v34 = vadd.f32 1e-12, %v4259_v29  ;;  %v4649_v29 = vld [vmem:[%s6161_s2 + $0x5] ss:$0 sm:$0xff] }
0x236c   :  { %v4260_v35 = vadd.f32 1e-12, %v4258_v33 }
0x236d   :  { %5385 = vrsqrt.f32 %v4261_v34 }
0x236e   :  { %5387 = vrsqrt.f32 %v4260_v35 }
0x2377   :  { %v5386_v36 = vpop.eup %5385 }
0x2378   :  { %v5388_v39 = vpop.eup %5387  ;;  %v4265_v40 = vmul.f32 %v5386_v36, %v4249_v18 }
0x2379   :  { %v4264_v42 = vmul.f32 %v5388_v39, %v4248_v38 }
0x237a   :  { %v4271_v44 = vmul.f32 %v4642_v27, %v4265_v40 }
0x237b   :  { %v4270_v45 = vmul.f32 %v4642_v27, %v4264_v42 }
0x237c   :  { %v4277_v30 = vadd.f32 %v4643_v43, %v4271_v44 }
0x237d   :  { %v4276_v46 = vadd.f32 %v4643_v43, %v4270_v45 }
0x237f   :  { %5139 = vmatprep.mubr.msk.f32.mxu1 %vm146_vm2, %v4276_v46 }
0x2380   :  { %5140 = vmatmul.mubr.msk.f32.vlgmr.msra.gmra.mrb[52].mxu1 %vm146_vm2, %v4277_v30 }
0x2381   :  { %5260 = vmatpush3.bf16.msra.mxu1 %v5257_v9 }
0x2382   :  { %5262 = vmatprep.subr.bf16.mxu1 %v5261_v14 }
0x2385   :  { %5264 = vmatpush3.bf16.msra.mxu1 %v5261_v14 }
0x2453   :  { %v5141_v7 = vpop.f32.mrb[52].mxu1 }
0x2454   :  { %v4365_v48 = vadd.f32 %v5141_v7, %v4644_v47  ;;  %v4359_v49 = vpop.f32.mrb[53].mxu1 }
0x2455   :  { %v4360_v12 = vadd.f32 %v4644_v47, %v4359_v49 }
0x2456   :  { %v4371_v50 = vmul.f32 0.70710677, %v4365_v48  ;;  %v4369_v53 = vmul.f32 0.5, %v4365_v48 }
0x2457   :  { %v4370_v32 = vmul.f32 0.70710677, %v4360_v12  ;;  %v4368_v54 = vmul.f32 0.5, %v4360_v12 }
0x2458   :  { %5389 = verf.f32 %v4371_v50 }
0x2459   :  { %5391 = verf.f32 %v4370_v32 }
0x2462   :  { %v5390_v51 = vpop.eup %5389 }
0x2463   :  { %v5392_v52 = vpop.eup %5391  ;;  %v4375_v11 = vadd.f32 1.0, %v5390_v51 }
0x2464   :  { %v4374_v55 = vadd.f32 1.0, %v5392_v52 }
0x2465   :  { %v4377_v56 = vmul.f32 %v4375_v11, %v4369_v53 }
0x2466   :  { %v4376_v57 = vmul.f32 %v4374_v55, %v4368_v54 }
0x2467   :  { %v4383_v58 = vsel %vm146_vm2, %v4377_v56, 0.0 }
0x2468   :  { %4384 = vadd.xlane.f32.xlu1 %v4383_v58  ;;  %v4380_v59 = vsel %vm146_vm2, %v4376_v57, 0.0 }
0x2469   :  { %4381 = vadd.xlane.f32.xlu0 %v4380_v59 }
0x24f5   :  { %v4385_v61 = vpop.xlane.xlu1 %4384 }
0x24f6   :  { %v4387_v41 = vmul.f32 0.03125, %v4385_v61  ;;  %v4382_v63 = vpop.xlane.xlu0 %4381 }
0x24f7   :  { %v4386_v0 = vmul.f32 0.03125, %v4382_v63 }
0x24f8   :  { %v4389_v1 = vsub.f32 %v4377_v56, %v4387_v41 }
0x24f9   :  { %v4388_v2 = vsub.f32 %v4376_v57, %v4386_v0 }
0x24fa   :  { %v4391_v60 = vmul.f32 %v4389_v1, %v4389_v1 }
0x24fb   :  { %v4390_v3 = vmul.f32 %v4388_v2, %v4388_v2 }
0x24fc   :  { %v4395_v5 = vsel %vm146_vm2, %v4391_v60, 0.0 }
0x24fd   :  { %4396 = vadd.xlane.f32.xlu1 %v4395_v5  ;;  %v4392_v6 = vsel %vm146_vm2, %v4390_v3, 0.0 }
0x24fe   :  { %4393 = vadd.xlane.f32.xlu0 %v4392_v6 }
0x258a   :  { %v4397_v15 = vpop.xlane.xlu1 %4396 }
0x258b   :  { %v4399_v16 = vmul.f32 0.03125, %v4397_v15  ;;  %v4394_v17 = vpop.xlane.xlu0 %4393 }
0x258c   :  { %v4398_v18 = vmul.f32 0.03125, %v4394_v17 }
0x258d   :  { %v4401_v38 = vadd.f32 1e-12, %v4399_v16 }
0x258e   :  { %v4400_v37 = vadd.f32 1e-12, %v4398_v18 }
0x258f   :  { %5393 = vrsqrt.f32 %v4401_v38 }
0x2590   :  { %5395 = vrsqrt.f32 %v4400_v37 }
0x2599   :  { %v5394_v19 = vpop.eup %5393 }
0x259a   :  { %v5396_v21 = vpop.eup %5395  ;;  %v4405_v22 = vmul.f32 %v5394_v19, %v4389_v1 }
0x259b   :  { %v4404_v23 = vmul.f32 %v5396_v21, %v4388_v2 }
0x259c   :  { %v4411_v24 = vmul.f32 %v4647_v20, %v4405_v22 }
0x259d   :  { %v4410_v25 = vmul.f32 %v4647_v20, %v4404_v23 }
0x259e   :  { %v4417_v28 = vadd.f32 %v4648_v10, %v4411_v24 }
0x259f   :  { %v4416_v26 = vadd.f32 %v4648_v10, %v4410_v25 }
0x25a1   :  { %5150 = vmatprep.mubr.msk.f32.mxu1 %vm146_vm2, %v4416_v26 }
0x25a2   :  { %5151 = vmatmul.mubr.msk.f32.vlgmr.msra.gmra.mrb[54].mxu1 %vm146_vm2, %v4417_v28 }
0x2675   :  { %v5152_v31 = vpop.f32.mrb[54].mxu1 }
0x2676   :  { %v4505_v33 = vadd.f32 %v5152_v31, %v4649_v29  ;;  %v4499_v34 = vpop.f32.mrb[55].mxu1 }
0x2677   :  { %v4500_v35 = vadd.f32 %v4649_v29, %v4499_v34 }
0x2678   :  { %4509 = vst [vmem:[#allocation2 + $0x8] sm:$0xff] %v4505_v33 }
0x2679   :  { %4508 = vst [vmem:[#allocation2] sm:$0xff] %v4500_v35 }
0x267a   :  { %5408 = shalt.err (!%p5405_p4)
}
0x267b   :  { %s5409_s2 = scalar_lea.hbm %s6169_s10, 256 }
0x267c   :  { %p5410_p5 = scmp.ne.s32.totalorder %s6169_s10, %s5409_s2  ;;  %p5413_p6 = scmp.lt.u32.totalorder %s5409_s2, %s6169_s10 }
0x267e   :  { %p5415_p7 = pnand %p5413_p6, %p5410_p5 }
0x2680   :  { %5418 = shalt.err (!%p5415_p7)
}
0x2681   :  { %s5438_s15 = smov 128   ;;  %s5439_s16 = smov 8  }
0x2682   :  { %4521 = dma.vmem_to_hbm [thread:$0]  %s4516_s24, 256, %s6169_s10, [#allocation3], %s5438_s15, %s5438_s15, %s5439_s16  }
0x2683   :  { %5419 = dma.done.wait [#allocation3], 256  }
0x2684   :  { %5420 = vsyncadd [#allocation3], 4294967040 }
0x2685   :  { %4525 = vsyncpa [#allocation3], 1 }

</bundles_post_ra>
